<compile_context>
chip_gen: v7x
topology: tpu7x:2x2x1
jax: 0.10.0
libtpu: 0.0.40
codegen_flags: <defaults>
</compile_context>

<pallas_src>
import functools

import jax
import jax.numpy as jnp
from jax.experimental import pallas as pl
from jax.experimental.pallas import tpu as pltpu


# ----------------------------------------------------------------------------
# helpers
# ----------------------------------------------------------------------------
def _row_tile(M):
    """Full-M row block at small sizes; 128-row blocks once M is large."""
    if M > 128 and M % 128 == 0:
        return 128
    return M


def _gelu(y):
    # TODO(synk): HF BERT uses exact erf-GELU; tanh approximation used here.
    c = 0.7978845608028654  # sqrt(2/pi)
    return 0.5 * y * (1.0 + jnp.tanh(c * (y + 0.044715 * y * y * y)))


# ----------------------------------------------------------------------------
# Pallas kernels
# ----------------------------------------------------------------------------
def _dense_kernel(x_ref, w_ref, b_ref, o_ref, *, activation):
    # bf16 operands on the MXU, f32 accumulate, f32 epilogue.
    y = jnp.dot(x_ref[...].astype(jnp.bfloat16), w_ref[...],
                preferred_element_type=jnp.float32)
    y = y + b_ref[...]                       # (1, N) broadcast over rows
    if activation == "gelu":
        y = _gelu(y)
    elif activation == "tanh":
        y = jnp.tanh(y)
    o_ref[...] = y


def dense(x, w, b, activation="none"):
    """y = act(x @ w + b).  x:(M,K) f32, w:(K,N) bf16, b:(N,) f32 -> (M,N) f32."""
    M, K = x.shape
    N = w.shape[1]
    tm = _row_tile(M)
    kernel = functools.partial(_dense_kernel, activation=activation)
    return pl.pallas_call(
        kernel,
        out_shape=jax.ShapeDtypeStruct((M, N), jnp.float32),
        grid=(M // tm,),
        in_specs=[
            pl.BlockSpec((tm, K), lambda i: (i, 0)),
            pl.BlockSpec((K, N), lambda i: (0, 0)),
            pl.BlockSpec((1, N), lambda i: (0, 0)),
        ],
        out_specs=pl.BlockSpec((tm, N), lambda i: (i, 0)),
        compiler_params=pltpu.CompilerParams(dimension_semantics=("parallel",)),
    )(x, w, b.reshape(1, N))


def _dense_res_ln_kernel(x_ref, w_ref, b_ref, r_ref, g_ref, bb_ref, o_ref, *, eps):
    # LN( x @ w + b + residual ), all reductions in f32.
    y = jnp.dot(x_ref[...].astype(jnp.bfloat16), w_ref[...],
                preferred_element_type=jnp.float32)
    y = y + b_ref[...] + r_ref[...]
    mu = jnp.mean(y, axis=-1, keepdims=True)
    yc = y - mu
    var = jnp.mean(yc * yc, axis=-1, keepdims=True)
    o_ref[...] = yc * jax.lax.rsqrt(var + eps) * g_ref[...] + bb_ref[...]


def dense_res_ln(x, w, b, residual, gamma, beta, eps=1e-12):
    """LayerNorm(x @ w + b + residual).  x:(M,K), w:(K,N) bf16, residual:(M,N)."""
    M, K = x.shape
    N = w.shape[1]
    tm = _row_tile(M)
    kernel = functools.partial(_dense_res_ln_kernel, eps=eps)
    return pl.pallas_call(
        kernel,
        out_shape=jax.ShapeDtypeStruct((M, N), jnp.float32),
        grid=(M // tm,),
        in_specs=[
            pl.BlockSpec((tm, K), lambda i: (i, 0)),
            pl.BlockSpec((K, N), lambda i: (0, 0)),
            pl.BlockSpec((1, N), lambda i: (0, 0)),
            pl.BlockSpec((tm, N), lambda i: (i, 0)),
            pl.BlockSpec((1, N), lambda i: (0, 0)),
            pl.BlockSpec((1, N), lambda i: (0, 0)),
        ],
        out_specs=pl.BlockSpec((tm, N), lambda i: (i, 0)),
        compiler_params=pltpu.CompilerParams(dimension_semantics=("parallel",)),
    )(x, w, b.reshape(1, N), residual, gamma.reshape(1, N), beta.reshape(1, N))


def _layernorm_kernel(x_ref, g_ref, b_ref, o_ref, *, eps):
    x = x_ref[...]
    mu = jnp.mean(x, axis=-1, keepdims=True)
    xc = x - mu
    var = jnp.mean(xc * xc, axis=-1, keepdims=True)
    o_ref[...] = xc * jax.lax.rsqrt(var + eps) * g_ref[...] + b_ref[...]


def layernorm(x, gamma, beta, eps=1e-12):
    """LayerNorm over the last axis.  x:(M,H) f32."""
    M, H = x.shape
    tm = _row_tile(M)
    kernel = functools.partial(_layernorm_kernel, eps=eps)
    return pl.pallas_call(
        kernel,
        out_shape=jax.ShapeDtypeStruct((M, H), jnp.float32),
        grid=(M // tm,),
        in_specs=[
            pl.BlockSpec((tm, H), lambda i: (i, 0)),
            pl.BlockSpec((1, H), lambda i: (0, 0)),
            pl.BlockSpec((1, H), lambda i: (0, 0)),
        ],
        out_specs=pl.BlockSpec((tm, H), lambda i: (i, 0)),
        compiler_params=pltpu.CompilerParams(dimension_semantics=("parallel",)),
    )(x, gamma.reshape(1, H), beta.reshape(1, H))


def _attn_kernel(q_ref, k_ref, v_ref, bias_ref, o_ref, *, scale):
    # All heads of one batch element per grid step.
    q = q_ref[0].astype(jnp.bfloat16)        # (NH, S, DH)
    k = k_ref[0].astype(jnp.bfloat16)        # (NH, S, DH)
    v = v_ref[0].astype(jnp.bfloat16)        # (NH, S, DH)
    # QK^T via last-axis contraction (no explicit transpose), f32 accumulate.
    s = jnp.einsum("hqd,hkd->hqk", q, k,
                   preferred_element_type=jnp.float32) * scale
    s = s + bias_ref[0]                      # (1, S) bias broadcast (heads, queries)
    m = jnp.max(s, axis=-1, keepdims=True)
    p = jnp.exp(s - m)
    l = jnp.sum(p, axis=-1, keepdims=True)
    p = p * pl.reciprocal(l, approx=True)    # EUP reciprocal instead of divide
    ctx = jnp.einsum("hqk,hkd->hqd", p.astype(jnp.bfloat16), v,
                     preferred_element_type=jnp.float32)
    o_ref[0] = ctx


def attention(q, k, v, mask_bias):
    """q,k,v: (B, NH, S, DH) f32; mask_bias: (B, S) additive bias (f32)."""
    B, NH, S, DH = q.shape
    bias3 = mask_bias.reshape(B, 1, S)
    kernel = functools.partial(_attn_kernel, scale=1.0 / (DH ** 0.5))
    return pl.pallas_call(
        kernel,
        out_shape=jax.ShapeDtypeStruct((B, NH, S, DH), jnp.float32),
        grid=(B,),
        in_specs=[
            pl.BlockSpec((1, NH, S, DH), lambda b: (b, 0, 0, 0)),
            pl.BlockSpec((1, NH, S, DH), lambda b: (b, 0, 0, 0)),
            pl.BlockSpec((1, NH, S, DH), lambda b: (b, 0, 0, 0)),
            pl.BlockSpec((1, 1, S), lambda b: (b, 0, 0)),
        ],
        out_specs=pl.BlockSpec((1, NH, S, DH), lambda b: (b, 0, 0, 0)),
        compiler_params=pltpu.CompilerParams(dimension_semantics=("parallel",)),
    )(q, k, v, bias3)


def _head_kernel(x_ref, pw_ref, pb_ref, ow_ref, ob_ref, o_ref):
    # pooler: tanh(cls @ pool_w + pool_b); classifier: pooled @ out_w + out_b
    pooled = jnp.dot(x_ref[...].astype(jnp.bfloat16), pw_ref[...],
                     preferred_element_type=jnp.float32) + pb_ref[...]
    pooled = jnp.tanh(pooled)
    logits = jnp.dot(pooled.astype(jnp.bfloat16), ow_ref[...],
                     preferred_element_type=jnp.float32) + ob_ref[...]
    o_ref[...] = logits


def head(cls_vec, pool_w, pool_b, out_w, out_b):
    """Fused pooler + Linear(H,1).  cls_vec:(B,H) -> (B,1)."""
    B, H = cls_vec.shape
    return pl.pallas_call(
        _head_kernel,
        out_shape=jax.ShapeDtypeStruct((B, 1), jnp.float32),
    )(cls_vec, pool_w, pool_b.reshape(1, H), out_w, out_b.reshape(1, 1))


# ----------------------------------------------------------------------------
# Model forward (inference semantics: dropouts are identity)
# ----------------------------------------------------------------------------
def bert_forward(params, ids, mask, token_type_ids, *, num_heads):
    B, S = ids.shape
    H = params["word_emb"].shape[1]
    DH = H // num_heads

    # --- embeddings (gathers are glue) ---
    emb = (jnp.take(params["word_emb"], ids, axis=0)
           + params["pos_emb"][:S][None, :, :]
           + jnp.take(params["type_emb"], token_type_ids, axis=0))
    h = layernorm(emb.reshape(B * S, H), params["emb_ln_g"], params["emb_ln_b"])
    # TODO(synk): embedding dropout (p=0.1) and bert_drop (p=0.3) are identity (eval mode).

    # HF-style additive attention-mask bias (applied in f32 before any bf16 cast).
    mask_bias = (1.0 - mask.astype(jnp.float32)) * -10000.0  # (B, S)

    def split_heads(x):  # (B*S, H) -> (B, NH, S, DH); cheap XLA transpose (glue)
        return x.reshape(B, S, num_heads, DH).transpose(0, 2, 1, 3)

    def merge_heads(x):  # (B, NH, S, DH) -> (B*S, H)
        return x.transpose(0, 2, 1, 3).reshape(B * S, H)

    # --- transformer encoder layers ---
    for lyr in params["layers"]:
        # fused QKV projection: one launch, lane-dense N = 3H output
        qkv = dense(h, lyr["w_qkv"], lyr["b_qkv"])
        q, k, v = jnp.split(qkv, 3, axis=-1)
        ctx = attention(split_heads(q), split_heads(k), split_heads(v), mask_bias)
        # fused: output projection + residual + LayerNorm
        h = dense_res_ln(merge_heads(ctx), lyr["wo"], lyr["bo"],
                         h, lyr["ln1_g"], lyr["ln1_b"])
        # FFN: dense+gelu, then fused dense + residual + LayerNorm
        ffn = dense(h, lyr["w1"], lyr["b1"], activation="gelu")
        h = dense_res_ln(ffn, lyr["w2"], lyr["b2"],
                         h, lyr["ln2_g"], lyr["ln2_b"])

    # --- pooler + Dropout(0.3) [identity] + Linear(H, 1), fused ---
    cls = h.reshape(B, S, H)[:, 0, :]
    logits = head(cls, params["pool_w"], params["pool_b"],
                  params["out_w"], params["out_b"])
    return logits  # (B, 1) float32


# ----------------------------------------------------------------------------
# Deterministic parameter init (synthetic stand-in for pretrained weights)
# ----------------------------------------------------------------------------
def init_params(key, *, vocab, hidden, heads, intermediate, layers, max_pos, type_vocab):
    keys = iter(jax.random.split(key, 8 + 8 * layers))

    def nrm(shape, dtype=jnp.bfloat16):
        # weight matrices stored bf16 (MXU operands); f32 accumulation in-kernel
        return (jax.random.normal(next(keys), shape, jnp.float32) * 0.02).astype(dtype)

    params = {
        "word_emb": nrm((vocab, hidden), jnp.float32),
        "pos_emb": nrm((max_pos, hidden), jnp.float32),
        "type_emb": nrm((type_vocab, hidden), jnp.float32),
        "emb_ln_g": jnp.ones((hidden,), jnp.float32),
        "emb_ln_b": jnp.zeros((hidden,), jnp.float32),
        "pool_w": nrm((hidden, hidden)),
        "pool_b": jnp.zeros((hidden,), jnp.float32),
        "out_w": nrm((hidden, 1)),
        "out_b": jnp.zeros((1,), jnp.float32),
        "layers": [],
    }
    for _ in range(layers):
        params["layers"].append({
            # fused Q|K|V weight (H, 3H) and bias (3H,)
            "w_qkv": nrm((hidden, 3 * hidden)),
            "b_qkv": jnp.zeros((3 * hidden,), jnp.float32),
            "wo": nrm((hidden, hidden)), "bo": jnp.zeros((hidden,), jnp.float32),
            "ln1_g": jnp.ones((hidden,), jnp.float32),
            "ln1_b": jnp.zeros((hidden,), jnp.float32),
            "w1": nrm((hidden, intermediate)),
            "b1": jnp.zeros((intermediate,), jnp.float32),
            "w2": nrm((intermediate, hidden)),
            "b2": jnp.zeros((hidden,), jnp.float32),
            "ln2_g": jnp.ones((hidden,), jnp.float32),
            "ln2_b": jnp.zeros((hidden,), jnp.float32),
        })
    return params


# ----------------------------------------------------------------------------
if __name__ == "__main__":
    cfg = dict(vocab=1000, hidden=128, heads=4, intermediate=512,
               layers=2, max_pos=64, type_vocab=2)
    B, S = 2, 16

    root = jax.random.PRNGKey(0)
    pkey, ikey = jax.random.split(root)
    params = init_params(pkey, **cfg)

    ids = jax.random.randint(ikey, (B, S), 0, cfg["vocab"], dtype=jnp.int32)
    mask = jnp.concatenate(
        [jnp.ones((B, 12), jnp.int32), jnp.zeros((B, 4), jnp.int32)], axis=1)
    token_type_ids = jnp.concatenate(
        [jnp.zeros((B, 8), jnp.int32), jnp.ones((B, 8), jnp.int32)], axis=1)

    fwd = jax.jit(functools.partial(bert_forward, num_heads=cfg["heads"]))
    out = fwd(params, ids, mask, token_type_ids)
    jax.block_until_ready(out)

    assert out.shape == (B, 1) and out.dtype == jnp.float32
    print("KERNEL_OK")
</pallas_src>

<mosaic_0001>
module attributes {stable_mosaic.version = 11 : i64} {
  func.func @_layernorm_kernel(%arg0: i32, %arg1: memref<32x128xf32, #tpu.memory_space<vmem>>, %arg2: memref<1x128xf32, #tpu.memory_space<vmem>>, %arg3: memref<1x128xf32, #tpu.memory_space<vmem>>, %arg4: memref<32x128xf32, #tpu.memory_space<vmem>>) attributes {dimension_semantics = [#tpu.dimension_semantics<parallel>], iteration_bounds = array<i64: 1>, scalar_prefetch = 0 : i64, scratch_operands = 0 : i64, tpu.core_type = #tpu.core_type<tc>, window_params = [{transform_indices = @transform_0, window_bounds = array<i64: 32, 128>}, {pipeline_mode = #tpu.pipeline_mode<synchronous>, transform_indices = @transform_1, window_bounds = array<i64: 1, 128>}, {pipeline_mode = #tpu.pipeline_mode<synchronous>, transform_indices = @transform_2, window_bounds = array<i64: 1, 128>}, {transform_indices = @transform_3, window_bounds = array<i64: 32, 128>}]} {
    %c0 = arith.constant 0 : index
    %c0_0 = arith.constant 0 : index
    %0 = vector.load %arg1[%c0, %c0_0] : memref<32x128xf32, #tpu.memory_space<vmem>>, vector<32x128xf32>
    %cst = arith.constant dense<0.000000e+00> : vector<32xf32>
    %1 = vector.multi_reduction <add>, %0, %cst [1] : vector<32x128xf32> to vector<32xf32>
    %2 = vector.shape_cast %1 : vector<32xf32> to vector<32x1xf32>
    %cst_1 = arith.constant 1.280000e+02 : f32
    %3 = vector.broadcast %cst_1 : f32 to vector<32x1xf32>
    %4 = arith.divf %2, %3 : vector<32x1xf32>
    %5 = vector.broadcast %4 : vector<32x1xf32> to vector<32x128xf32>
    %6 = arith.subf %0, %5 : vector<32x128xf32>
    %7 = arith.mulf %6, %6 : vector<32x128xf32>
    %cst_2 = arith.constant dense<0.000000e+00> : vector<32xf32>
    %8 = vector.multi_reduction <add>, %7, %cst_2 [1] : vector<32x128xf32> to vector<32xf32>
    %9 = vector.shape_cast %8 : vector<32xf32> to vector<32x1xf32>
    %cst_3 = arith.constant 1.280000e+02 : f32
    %10 = vector.broadcast %cst_3 : f32 to vector<32x1xf32>
    %11 = arith.divf %9, %10 : vector<32x1xf32>
    %cst_4 = arith.constant 9.99999996E-13 : f32
    %12 = vector.broadcast %cst_4 : f32 to vector<32x1xf32>
    %13 = arith.addf %11, %12 : vector<32x1xf32>
    %14 = math.rsqrt %13 : vector<32x1xf32>
    %15 = vector.broadcast %14 : vector<32x1xf32> to vector<32x128xf32>
    %16 = arith.mulf %6, %15 : vector<32x128xf32>
    %c0_5 = arith.constant 0 : index
    %c0_6 = arith.constant 0 : index
    %17 = vector.load %arg2[%c0_5, %c0_6] : memref<1x128xf32, #tpu.memory_space<vmem>>, vector<1x128xf32>
    %18 = vector.broadcast %17 : vector<1x128xf32> to vector<32x128xf32>
    %19 = arith.mulf %16, %18 : vector<32x128xf32>
    %c0_7 = arith.constant 0 : index
    %c0_8 = arith.constant 0 : index
    %20 = vector.load %arg3[%c0_7, %c0_8] : memref<1x128xf32, #tpu.memory_space<vmem>>, vector<1x128xf32>
    %21 = vector.broadcast %20 : vector<1x128xf32> to vector<32x128xf32>
    %22 = arith.addf %19, %21 : vector<32x128xf32>
    %c0_9 = arith.constant 0 : index
    %c0_10 = arith.constant 0 : index
    %23 = vector.load %arg4[%c0_9, %c0_10] : memref<32x128xf32, #tpu.memory_space<vmem>>, vector<32x128xf32>
    tpu.vector_store %arg4[%c0_9, %c0_10], %22 {strides = array<i32>} : memref<32x128xf32, #tpu.memory_space<vmem>>, vector<32x128xf32>,
    return
  }
  func.func @transform_0(%arg0: i32) -> (i32, i32) {
    %c0_i32 = arith.constant 0 : i32
    %c0_i32_0 = arith.constant 0 : i32
    return %arg0, %c0_i32 : i32, i32
  }
  func.func @transform_1(%arg0: i32) -> (i32, i32) {
    %c0_i32 = arith.constant 0 : i32
    %c0_i32_0 = arith.constant 0 : i32
    %c0_i32_1 = arith.constant 0 : i32
    return %c0_i32, %c0_i32_0 : i32, i32
  }
  func.func @transform_2(%arg0: i32) -> (i32, i32) {
    %c0_i32 = arith.constant 0 : i32
    %c0_i32_0 = arith.constant 0 : i32
    %c0_i32_1 = arith.constant 0 : i32
    return %c0_i32, %c0_i32_0 : i32, i32
  }
  func.func @transform_3(%arg0: i32) -> (i32, i32) {
    %c0_i32 = arith.constant 0 : i32
    %c0_i32_0 = arith.constant 0 : i32
    return %arg0, %c0_i32 : i32, i32
  }
}

module attributes {stable_mosaic.version = 11 : i64} {
  func.func @_dense_kernel(%arg0: i32, %arg1: memref<32x128xf32, #tpu.memory_space<vmem>>, %arg2: memref<128x384xbf16, #tpu.memory_space<vmem>>, %arg3: memref<1x384xf32, #tpu.memory_space<vmem>>, %arg4: memref<32x384xf32, #tpu.memory_space<vmem>>) attributes {dimension_semantics = [#tpu.dimension_semantics<parallel>], iteration_bounds = array<i64: 1>, scalar_prefetch = 0 : i64, scratch_operands = 0 : i64, tpu.core_type = #tpu.core_type<tc>, window_params = [{transform_indices = @transform_0, window_bounds = array<i64: 32, 128>}, {pipeline_mode = #tpu.pipeline_mode<synchronous>, transform_indices = @transform_1, window_bounds = array<i64: 128, 384>}, {pipeline_mode = #tpu.pipeline_mode<synchronous>, transform_indices = @transform_2, window_bounds = array<i64: 1, 384>}, {transform_indices = @transform_3, window_bounds = array<i64: 32, 384>}]} {
    %c0 = arith.constant 0 : index
    %c0_0 = arith.constant 0 : index
    %0 = vector.load %arg1[%c0, %c0_0] : memref<32x128xf32, #tpu.memory_space<vmem>>, vector<32x128xf32>
    %1 = arith.truncf %0 : vector<32x128xf32> to vector<32x128xbf16>
    %c0_1 = arith.constant 0 : index
    %c0_2 = arith.constant 0 : index
    %2 = vector.load %arg2[%c0_1, %c0_2] : memref<128x384xbf16, #tpu.memory_space<vmem>>, vector<128x384xbf16>
    %cst = arith.constant dense<0.000000e+00> : vector<32x384xf32>
    %3 = tpu.matmul %1, %2, %cst {dimension_numbers = #tpu.dot_dimension_numbers<[1], [0], [0], [1], [0, 0, 1, 1], [], []>} : vector<32x128xbf16>, vector<128x384xbf16>, vector<32x384xf32> -> vector<32x384xf32>
    %c0_3 = arith.constant 0 : index
    %c0_4 = arith.constant 0 : index
    %4 = vector.load %arg3[%c0_3, %c0_4] : memref<1x384xf32, #tpu.memory_space<vmem>>, vector<1x384xf32>
    %5 = vector.broadcast %4 : vector<1x384xf32> to vector<32x384xf32>
    %6 = arith.addf %3, %5 : vector<32x384xf32>
    %c0_5 = arith.constant 0 : index
    %c0_6 = arith.constant 0 : index
    %7 = vector.load %arg4[%c0_5, %c0_6] : memref<32x384xf32, #tpu.memory_space<vmem>>, vector<32x384xf32>
    tpu.vector_store %arg4[%c0_5, %c0_6], %6 {strides = array<i32>} : memref<32x384xf32, #tpu.memory_space<vmem>>, vector<32x384xf32>,
    return
  }
  func.func @transform_0(%arg0: i32) -> (i32, i32) {
    %c0_i32 = arith.constant 0 : i32
    %c0_i32_0 = arith.constant 0 : i32
    return %arg0, %c0_i32 : i32, i32
  }
  func.func @transform_1(%arg0: i32) -> (i32, i32) {
    %c0_i32 = arith.constant 0 : i32
    %c0_i32_0 = arith.constant 0 : i32
    %c0_i32_1 = arith.constant 0 : i32
    return %c0_i32, %c0_i32_0 : i32, i32
  }
  func.func @transform_2(%arg0: i32) -> (i32, i32) {
    %c0_i32 = arith.constant 0 : i32
    %c0_i32_0 = arith.constant 0 : i32
    %c0_i32_1 = arith.constant 0 : i32
    return %c0_i32, %c0_i32_0 : i32, i32
  }
  func.func @transform_3(%arg0: i32) -> (i32, i32) {
    %c0_i32 = arith.constant 0 : i32
    %c0_i32_0 = arith.constant 0 : i32
    return %arg0, %c0_i32 : i32, i32
  }
}

module attributes {stable_mosaic.version = 11 : i64} {
  func.func @_attn_kernel(%arg0: i32, %arg1: memref<1x4x16x32xf32, #tpu.memory_space<vmem>>, %arg2: memref<1x4x16x32xf32, #tpu.memory_space<vmem>>, %arg3: memref<1x4x16x32xf32, #tpu.memory_space<vmem>>, %arg4: memref<1x1x16xf32, #tpu.memory_space<vmem>>, %arg5: memref<1x4x16x32xf32, #tpu.memory_space<vmem>>) attributes {dimension_semantics = [#tpu.dimension_semantics<parallel>], iteration_bounds = array<i64: 2>, scalar_prefetch = 0 : i64, scratch_operands = 0 : i64, tpu.core_type = #tpu.core_type<tc>, window_params = [{transform_indices = @transform_0, window_bounds = array<i64: 1, 4, 16, 32>}, {transform_indices = @transform_1, window_bounds = array<i64: 1, 4, 16, 32>}, {transform_indices = @transform_2, window_bounds = array<i64: 1, 4, 16, 32>}, {transform_indices = @transform_3, window_bounds = array<i64: 1, 1, 16>}, {transform_indices = @transform_4, window_bounds = array<i64: 1, 4, 16, 32>}]} {
    %c0 = arith.constant 0 : index
    %c0_0 = arith.constant 0 : index
    %c0_1 = arith.constant 0 : index
    %c0_2 = arith.constant 0 : index
    %0 = vector.load %arg1[%c0, %c0_0, %c0_1, %c0_2] : memref<1x4x16x32xf32, #tpu.memory_space<vmem>>, vector<1x4x16x32xf32>
    %1 = vector.shape_cast %0 : vector<1x4x16x32xf32> to vector<4x16x32xf32>
    %2 = arith.truncf %1 : vector<4x16x32xf32> to vector<4x16x32xbf16>
    %c0_3 = arith.constant 0 : index
    %c0_4 = arith.constant 0 : index
    %c0_5 = arith.constant 0 : index
    %c0_6 = arith.constant 0 : index
    %3 = vector.load %arg2[%c0_3, %c0_4, %c0_5, %c0_6] : memref<1x4x16x32xf32, #tpu.memory_space<vmem>>, vector<1x4x16x32xf32>
    %4 = vector.shape_cast %3 : vector<1x4x16x32xf32> to vector<4x16x32xf32>
    %5 = arith.truncf %4 : vector<4x16x32xf32> to vector<4x16x32xbf16>
    %c0_7 = arith.constant 0 : index
    %c0_8 = arith.constant 0 : index
    %c0_9 = arith.constant 0 : index
    %c0_10 = arith.constant 0 : index
    %6 = vector.load %arg3[%c0_7, %c0_8, %c0_9, %c0_10] : memref<1x4x16x32xf32, #tpu.memory_space<vmem>>, vector<1x4x16x32xf32>
    %7 = vector.shape_cast %6 : vector<1x4x16x32xf32> to vector<4x16x32xf32>
    %8 = arith.truncf %7 : vector<4x16x32xf32> to vector<4x16x32xbf16>
    "tpu.trace_start"() <{level = 10 : i32, message = "hqd,hkd->hqk"}> : () -> ()
    %cst = arith.constant dense<0.000000e+00> : vector<4x16x16xf32>
    %9 = tpu.matmul %2, %5, %cst {dimension_numbers = #tpu.dot_dimension_numbers<[2], [2], [1], [1], [0, 0, 0, 1, 1, 1], [0], [0]>} : vector<4x16x32xbf16>, vector<4x16x32xbf16>, vector<4x16x16xf32> -> vector<4x16x16xf32>
    "tpu.trace_stop"() : () -> ()
    %cst_11 = arith.constant 0.176776692 : f32
    %10 = vector.broadcast %cst_11 : f32 to vector<4x16x16xf32>
    %11 = arith.mulf %9, %10 : vector<4x16x16xf32>
    %c0_12 = arith.constant 0 : index
    %c0_13 = arith.constant 0 : index
    %c0_14 = arith.constant 0 : index
    %12 = vector.load %arg4[%c0_12, %c0_13, %c0_14] : memref<1x1x16xf32, #tpu.memory_space<vmem>>, vector<1x1x16xf32>
    %13 = vector.shape_cast %12 : vector<1x1x16xf32> to vector<1x16xf32>
    %14 = vector.shape_cast %13 : vector<1x16xf32> to vector<1x1x16xf32>
    %15 = vector.broadcast %14 : vector<1x1x16xf32> to vector<4x16x16xf32>
    %16 = arith.addf %11, %15 : vector<4x16x16xf32>
    %cst_15 = arith.constant dense<0xFF800000> : vector<4x16xf32>
    %17 = vector.multi_reduction <maximumf>, %16, %cst_15 [2] : vector<4x16x16xf32> to vector<4x16xf32>
    %18 = vector.shape_cast %17 : vector<4x16xf32> to vector<4x16x1xf32>
    %19 = vector.broadcast %18 : vector<4x16x1xf32> to vector<4x16x16xf32>
    %20 = arith.subf %16, %19 : vector<4x16x16xf32>
    %21 = math.exp %20 : vector<4x16x16xf32>
    %cst_16 = arith.constant dense<0.000000e+00> : vector<4x16xf32>
    %22 = vector.multi_reduction <add>, %21, %cst_16 [2] : vector<4x16x16xf32> to vector<4x16xf32>
    %23 = vector.shape_cast %22 : vector<4x16xf32> to vector<4x16x1xf32>
    %24 = tpu.reciprocal %23 {approx = true} : vector<4x16x1xf32> -> vector<4x16x1xf32>
    %25 = vector.broadcast %24 : vector<4x16x1xf32> to vector<4x16x16xf32>
    %26 = arith.mulf %21, %25 : vector<4x16x16xf32>
    %27 = arith.truncf %26 : vector<4x16x16xf32> to vector<4x16x16xbf16>
    "tpu.trace_start"() <{level = 10 : i32, message = "hqk,hkd->hqd"}> : () -> ()
    %cst_17 = arith.constant dense<0.000000e+00> : vector<4x16x32xf32>
    %28 = tpu.matmul %27, %8, %cst_17 {dimension_numbers = #tpu.dot_dimension_numbers<[2], [1], [1], [2], [0, 0, 0, 1, 1, 2], [0], [0]>} : vector<4x16x16xbf16>, vector<4x16x32xbf16>, vector<4x16x32xf32> -> vector<4x16x32xf32>
    "tpu.trace_stop"() : () -> ()
    %c0_18 = arith.constant 0 : index
    %c0_19 = arith.constant 0 : index
    %c0_20 = arith.constant 0 : index
    %c0_21 = arith.constant 0 : index
    %29 = vector.load %arg5[%c0_18, %c0_19, %c0_20, %c0_21] : memref<1x4x16x32xf32, #tpu.memory_space<vmem>>, vector<1x4x16x32xf32>
    %30 = vector.shape_cast %29 : vector<1x4x16x32xf32> to vector<4x16x32xf32>
    %31 = vector.shape_cast %28 : vector<4x16x32xf32> to vector<1x4x16x32xf32>
    tpu.vector_store %arg5[%c0_18, %c0_19, %c0_20, %c0_21], %31 {strides = array<i32>} : memref<1x4x16x32xf32, #tpu.memory_space<vmem>>, vector<1x4x16x32xf32>,
    return
  }
  func.func @transform_0(%arg0: i32) -> (i32, i32, i32, i32) {
    %c0_i32 = arith.constant 0 : i32
    %c0_i32_0 = arith.constant 0 : i32
    %c0_i32_1 = arith.constant 0 : i32
    %c0_i32_2 = arith.constant 0 : i32
    return %arg0, %c0_i32, %c0_i32_0, %c0_i32_1 : i32, i32, i32, i32
  }
  func.func @transform_1(%arg0: i32) -> (i32, i32, i32, i32) {
    %c0_i32 = arith.constant 0 : i32
    %c0_i32_0 = arith.constant 0 : i32
    %c0_i32_1 = arith.constant 0 : i32
    %c0_i32_2 = arith.constant 0 : i32
    return %arg0, %c0_i32, %c0_i32_0, %c0_i32_1 : i32, i32, i32, i32
  }
  func.func @transform_2(%arg0: i32) -> (i32, i32, i32, i32) {
    %c0_i32 = arith.constant 0 : i32
    %c0_i32_0 = arith.constant 0 : i32
    %c0_i32_1 = arith.constant 0 : i32
    %c0_i32_2 = arith.constant 0 : i32
    return %arg0, %c0_i32, %c0_i32_0, %c0_i32_1 : i32, i32, i32, i32
  }
  func.func @transform_3(%arg0: i32) -> (i32, i32, i32) {
    %c0_i32 = arith.constant 0 : i32
    %c0_i32_0 = arith.constant 0 : i32
    %c0_i32_1 = arith.constant 0 : i32
    return %arg0, %c0_i32, %c0_i32_0 : i32, i32, i32
  }
  func.func @transform_4(%arg0: i32) -> (i32, i32, i32, i32) {
    %c0_i32 = arith.constant 0 : i32
    %c0_i32_0 = arith.constant 0 : i32
    %c0_i32_1 = arith.constant 0 : i32
    %c0_i32_2 = arith.constant 0 : i32
    return %arg0, %c0_i32, %c0_i32_0, %c0_i32_1 : i32, i32, i32, i32
  }
}

module attributes {stable_mosaic.version = 11 : i64} {
  func.func @_dense_res_ln_kernel(%arg0: i32, %arg1: memref<32x128xf32, #tpu.memory_space<vmem>>, %arg2: memref<128x128xbf16, #tpu.memory_space<vmem>>, %arg3: memref<1x128xf32, #tpu.memory_space<vmem>>, %arg4: memref<32x128xf32, #tpu.memory_space<vmem>>, %arg5: memref<1x128xf32, #tpu.memory_space<vmem>>, %arg6: memref<1x128xf32, #tpu.memory_space<vmem>>, %arg7: memref<32x128xf32, #tpu.memory_space<vmem>>) attributes {dimension_semantics = [#tpu.dimension_semantics<parallel>], iteration_bounds = array<i64: 1>, scalar_prefetch = 0 : i64, scratch_operands = 0 : i64, tpu.core_type = #tpu.core_type<tc>, window_params = [{transform_indices = @transform_0, window_bounds = array<i64: 32, 128>}, {pipeline_mode = #tpu.pipeline_mode<synchronous>, transform_indices = @transform_1, window_bounds = array<i64: 128, 128>}, {pipeline_mode = #tpu.pipeline_mode<synchronous>, transform_indices = @transform_2, window_bounds = array<i64: 1, 128>}, {transform_indices = @transform_3, window_bounds = array<i64: 32, 128>}, {pipeline_mode = #tpu.pipeline_mode<synchronous>, transform_indices = @transform_4, window_bounds = array<i64: 1, 128>}, {pipeline_mode = #tpu.pipeline_mode<synchronous>, transform_indices = @transform_5, window_bounds = array<i64: 1, 128>}, {transform_indices = @transform_6, window_bounds = array<i64: 32, 128>}]} {
    %c0 = arith.constant 0 : index
    %c0_0 = arith.constant 0 : index
    %0 = vector.load %arg1[%c0, %c0_0] : memref<32x128xf32, #tpu.memory_space<vmem>>, vector<32x128xf32>
    %1 = arith.truncf %0 : vector<32x128xf32> to vector<32x128xbf16>
    %c0_1 = arith.constant 0 : index
    %c0_2 = arith.constant 0 : index
    %2 = vector.load %arg2[%c0_1, %c0_2] : memref<128x128xbf16, #tpu.memory_space<vmem>>, vector<128x128xbf16>
    %cst = arith.constant dense<0.000000e+00> : vector<32x128xf32>
    %3 = tpu.matmul %1, %2, %cst {dimension_numbers = #tpu.dot_dimension_numbers<[1], [0], [0], [1], [0, 0, 1, 1], [], []>} : vector<32x128xbf16>, vector<128x128xbf16>, vector<32x128xf32> -> vector<32x128xf32>
    %c0_3 = arith.constant 0 : index
    %c0_4 = arith.constant 0 : index
    %4 = vector.load %arg3[%c0_3, %c0_4] : memref<1x128xf32, #tpu.memory_space<vmem>>, vector<1x128xf32>
    %5 = vector.broadcast %4 : vector<1x128xf32> to vector<32x128xf32>
    %6 = arith.addf %3, %5 : vector<32x128xf32>
    %c0_5 = arith.constant 0 : index
    %c0_6 = arith.constant 0 : index
    %7 = vector.load %arg4[%c0_5, %c0_6] : memref<32x128xf32, #tpu.memory_space<vmem>>, vector<32x128xf32>
    %8 = arith.addf %6, %7 : vector<32x128xf32>
    %cst_7 = arith.constant dense<0.000000e+00> : vector<32xf32>
    %9 = vector.multi_reduction <add>, %8, %cst_7 [1] : vector<32x128xf32> to vector<32xf32>
    %10 = vector.shape_cast %9 : vector<32xf32> to vector<32x1xf32>
    %cst_8 = arith.constant 1.280000e+02 : f32
    %11 = vector.broadcast %cst_8 : f32 to vector<32x1xf32>
    %12 = arith.divf %10, %11 : vector<32x1xf32>
    %13 = vector.broadcast %12 : vector<32x1xf32> to vector<32x128xf32>
    %14 = arith.subf %8, %13 : vector<32x128xf32>
    %15 = arith.mulf %14, %14 : vector<32x128xf32>
    %cst_9 = arith.constant dense<0.000000e+00> : vector<32xf32>
    %16 = vector.multi_reduction <add>, %15, %cst_9 [1] : vector<32x128xf32> to vector<32xf32>
    %17 = vector.shape_cast %16 : vector<32xf32> to vector<32x1xf32>
    %cst_10 = arith.constant 1.280000e+02 : f32
    %18 = vector.broadcast %cst_10 : f32 to vector<32x1xf32>
    %19 = arith.divf %17, %18 : vector<32x1xf32>
    %cst_11 = arith.constant 9.99999996E-13 : f32
    %20 = vector.broadcast %cst_11 : f32 to vector<32x1xf32>
    %21 = arith.addf %19, %20 : vector<32x1xf32>
    %22 = math.rsqrt %21 : vector<32x1xf32>
    %23 = vector.broadcast %22 : vector<32x1xf32> to vector<32x128xf32>
    %24 = arith.mulf %14, %23 : vector<32x128xf32>
    %c0_12 = arith.constant 0 : index
    %c0_13 = arith.constant 0 : index
    %25 = vector.load %arg5[%c0_12, %c0_13] : memref<1x128xf32, #tpu.memory_space<vmem>>, vector<1x128xf32>
    %26 = vector.broadcast %25 : vector<1x128xf32> to vector<32x128xf32>
    %27 = arith.mulf %24, %26 : vector<32x128xf32>
    %c0_14 = arith.constant 0 : index
    %c0_15 = arith.constant 0 : index
    %28 = vector.load %arg6[%c0_14, %c0_15] : memref<1x128xf32, #tpu.memory_space<vmem>>, vector<1x128xf32>
    %29 = vector.broadcast %28 : vector<1x128xf32> to vector<32x128xf32>
    %30 = arith.addf %27, %29 : vector<32x128xf32>
    %c0_16 = arith.constant 0 : index
    %c0_17 = arith.constant 0 : index
    %31 = vector.load %arg7[%c0_16, %c0_17] : memref<32x128xf32, #tpu.memory_space<vmem>>, vector<32x128xf32>
    tpu.vector_store %arg7[%c0_16, %c0_17], %30 {strides = array<i32>} : memref<32x128xf32, #tpu.memory_space<vmem>>, vector<32x128xf32>,
    return
  }
  func.func @transform_0(%arg0: i32) -> (i32, i32) {
    %c0_i32 = arith.constant 0 : i32
    %c0_i32_0 = arith.constant 0 : i32
    return %arg0, %c0_i32 : i32, i32
  }
  func.func @transform_1(%arg0: i32) -> (i32, i32) {
    %c0_i32 = arith.constant 0 : i32
    %c0_i32_0 = arith.constant 0 : i32
    %c0_i32_1 = arith.constant 0 : i32
    return %c0_i32, %c0_i32_0 : i32, i32
  }
  func.func @transform_2(%arg0: i32) -> (i32, i32) {
    %c0_i32 = arith.constant 0 : i32
    %c0_i32_0 = arith.constant 0 : i32
    %c0_i32_1 = arith.constant 0 : i32
    return %c0_i32, %c0_i32_0 : i32, i32
  }
  func.func @transform_3(%arg0: i32) -> (i32, i32) {
    %c0_i32 = arith.constant 0 : i32
    %c0_i32_0 = arith.constant 0 : i32
    return %arg0, %c0_i32 : i32, i32
  }
  func.func @transform_4(%arg0: i32) -> (i32, i32) {
    %c0_i32 = arith.constant 0 : i32
    %c0_i32_0 = arith.constant 0 : i32
    %c0_i32_1 = arith.constant 0 : i32
    return %c0_i32, %c0_i32_0 : i32, i32
  }
  func.func @transform_5(%arg0: i32) -> (i32, i32) {
    %c0_i32 = arith.constant 0 : i32
    %c0_i32_0 = arith.constant 0 : i32
    %c0_i32_1 = arith.constant 0 : i32
    return %c0_i32, %c0_i32_0 : i32, i32
  }
  func.func @transform_6(%arg0: i32) -> (i32, i32) {
    %c0_i32 = arith.constant 0 : i32
    %c0_i32_0 = arith.constant 0 : i32
    return %arg0, %c0_i32 : i32, i32
  }
}

module attributes {stable_mosaic.version = 11 : i64} {
  func.func @_dense_kernel(%arg0: i32, %arg1: memref<32x128xf32, #tpu.memory_space<vmem>>, %arg2: memref<128x512xbf16, #tpu.memory_space<vmem>>, %arg3: memref<1x512xf32, #tpu.memory_space<vmem>>, %arg4: memref<32x512xf32, #tpu.memory_space<vmem>>) attributes {dimension_semantics = [#tpu.dimension_semantics<parallel>], iteration_bounds = array<i64: 1>, scalar_prefetch = 0 : i64, scratch_operands = 0 : i64, tpu.core_type = #tpu.core_type<tc>, window_params = [{transform_indices = @transform_0, window_bounds = array<i64: 32, 128>}, {pipeline_mode = #tpu.pipeline_mode<synchronous>, transform_indices = @transform_1, window_bounds = array<i64: 128, 512>}, {pipeline_mode = #tpu.pipeline_mode<synchronous>, transform_indices = @transform_2, window_bounds = array<i64: 1, 512>}, {transform_indices = @transform_3, window_bounds = array<i64: 32, 512>}]} {
    %c0 = arith.constant 0 : index
    %c0_0 = arith.constant 0 : index
    %0 = vector.load %arg1[%c0, %c0_0] : memref<32x128xf32, #tpu.memory_space<vmem>>, vector<32x128xf32>
    %1 = arith.truncf %0 : vector<32x128xf32> to vector<32x128xbf16>
    %c0_1 = arith.constant 0 : index
    %c0_2 = arith.constant 0 : index
    %2 = vector.load %arg2[%c0_1, %c0_2] : memref<128x512xbf16, #tpu.memory_space<vmem>>, vector<128x512xbf16>
    %cst = arith.constant dense<0.000000e+00> : vector<32x512xf32>
    %3 = tpu.matmul %1, %2, %cst {dimension_numbers = #tpu.dot_dimension_numbers<[1], [0], [0], [1], [0, 0, 1, 1], [], []>} : vector<32x128xbf16>, vector<128x512xbf16>, vector<32x512xf32> -> vector<32x512xf32>
    %c0_3 = arith.constant 0 : index
    %c0_4 = arith.constant 0 : index
    %4 = vector.load %arg3[%c0_3, %c0_4] : memref<1x512xf32, #tpu.memory_space<vmem>>, vector<1x512xf32>
    %5 = vector.broadcast %4 : vector<1x512xf32> to vector<32x512xf32>
    %6 = arith.addf %3, %5 : vector<32x512xf32>
    %cst_5 = arith.constant 5.000000e-01 : f32
    %7 = vector.broadcast %cst_5 : f32 to vector<32x512xf32>
    %8 = arith.mulf %7, %6 : vector<32x512xf32>
    %cst_6 = arith.constant 4.471500e-02 : f32
    %9 = vector.broadcast %cst_6 : f32 to vector<32x512xf32>
    %10 = arith.mulf %9, %6 : vector<32x512xf32>
    %11 = arith.mulf %10, %6 : vector<32x512xf32>
    %12 = arith.mulf %11, %6 : vector<32x512xf32>
    %13 = arith.addf %6, %12 : vector<32x512xf32>
    %cst_7 = arith.constant 0.797884583 : f32
    %14 = vector.broadcast %cst_7 : f32 to vector<32x512xf32>
    %15 = arith.mulf %14, %13 : vector<32x512xf32>
    %16 = math.tanh %15 : vector<32x512xf32>
    %cst_8 = arith.constant 1.000000e+00 : f32
    %17 = vector.broadcast %cst_8 : f32 to vector<32x512xf32>
    %18 = arith.addf %17, %16 : vector<32x512xf32>
    %19 = arith.mulf %8, %18 : vector<32x512xf32>
    %c0_9 = arith.constant 0 : index
    %c0_10 = arith.constant 0 : index
    %20 = vector.load %arg4[%c0_9, %c0_10] : memref<32x512xf32, #tpu.memory_space<vmem>>, vector<32x512xf32>
    tpu.vector_store %arg4[%c0_9, %c0_10], %19 {strides = array<i32>} : memref<32x512xf32, #tpu.memory_space<vmem>>, vector<32x512xf32>,
    return
  }
  func.func @transform_0(%arg0: i32) -> (i32, i32) {
    %c0_i32 = arith.constant 0 : i32
    %c0_i32_0 = arith.constant 0 : i32
    return %arg0, %c0_i32 : i32, i32
  }
  func.func @transform_1(%arg0: i32) -> (i32, i32) {
    %c0_i32 = arith.constant 0 : i32
    %c0_i32_0 = arith.constant 0 : i32
    %c0_i32_1 = arith.constant 0 : i32
    return %c0_i32, %c0_i32_0 : i32, i32
  }
  func.func @transform_2(%arg0: i32) -> (i32, i32) {
    %c0_i32 = arith.constant 0 : i32
    %c0_i32_0 = arith.constant 0 : i32
    %c0_i32_1 = arith.constant 0 : i32
    return %c0_i32, %c0_i32_0 : i32, i32
  }
  func.func @transform_3(%arg0: i32) -> (i32, i32) {
    %c0_i32 = arith.constant 0 : i32
    %c0_i32_0 = arith.constant 0 : i32
    return %arg0, %c0_i32 : i32, i32
  }
}

module attributes {stable_mosaic.version = 11 : i64} {
  func.func @_dense_res_ln_kernel(%arg0: i32, %arg1: memref<32x512xf32, #tpu.memory_space<vmem>>, %arg2: memref<512x128xbf16, #tpu.memory_space<vmem>>, %arg3: memref<1x128xf32, #tpu.memory_space<vmem>>, %arg4: memref<32x128xf32, #tpu.memory_space<vmem>>, %arg5: memref<1x128xf32, #tpu.memory_space<vmem>>, %arg6: memref<1x128xf32, #tpu.memory_space<vmem>>, %arg7: memref<32x128xf32, #tpu.memory_space<vmem>>) attributes {dimension_semantics = [#tpu.dimension_semantics<parallel>], iteration_bounds = array<i64: 1>, scalar_prefetch = 0 : i64, scratch_operands = 0 : i64, tpu.core_type = #tpu.core_type<tc>, window_params = [{transform_indices = @transform_0, window_bounds = array<i64: 32, 512>}, {pipeline_mode = #tpu.pipeline_mode<synchronous>, transform_indices = @transform_1, window_bounds = array<i64: 512, 128>}, {pipeline_mode = #tpu.pipeline_mode<synchronous>, transform_indices = @transform_2, window_bounds = array<i64: 1, 128>}, {transform_indices = @transform_3, window_bounds = array<i64: 32, 128>}, {pipeline_mode = #tpu.pipeline_mode<synchronous>, transform_indices = @transform_4, window_bounds = array<i64: 1, 128>}, {pipeline_mode = #tpu.pipeline_mode<synchronous>, transform_indices = @transform_5, window_bounds = array<i64: 1, 128>}, {transform_indices = @transform_6, window_bounds = array<i64: 32, 128>}]} {
    %c0 = arith.constant 0 : index
    %c0_0 = arith.constant 0 : index
    %0 = vector.load %arg1[%c0, %c0_0] : memref<32x512xf32, #tpu.memory_space<vmem>>, vector<32x512xf32>
    %1 = arith.truncf %0 : vector<32x512xf32> to vector<32x512xbf16>
    %c0_1 = arith.constant 0 : index
    %c0_2 = arith.constant 0 : index
    %2 = vector.load %arg2[%c0_1, %c0_2] : memref<512x128xbf16, #tpu.memory_space<vmem>>, vector<512x128xbf16>
    %cst = arith.constant dense<0.000000e+00> : vector<32x128xf32>
    %3 = tpu.matmul %1, %2, %cst {dimension_numbers = #tpu.dot_dimension_numbers<[1], [0], [0], [1], [0, 0, 1, 1], [], []>} : vector<32x512xbf16>, vector<512x128xbf16>, vector<32x128xf32> -> vector<32x128xf32>
    %c0_3 = arith.constant 0 : index
    %c0_4 = arith.constant 0 : index
    %4 = vector.load %arg3[%c0_3, %c0_4] : memref<1x128xf32, #tpu.memory_space<vmem>>, vector<1x128xf32>
    %5 = vector.broadcast %4 : vector<1x128xf32> to vector<32x128xf32>
    %6 = arith.addf %3, %5 : vector<32x128xf32>
    %c0_5 = arith.constant 0 : index
    %c0_6 = arith.constant 0 : index
    %7 = vector.load %arg4[%c0_5, %c0_6] : memref<32x128xf32, #tpu.memory_space<vmem>>, vector<32x128xf32>
    %8 = arith.addf %6, %7 : vector<32x128xf32>
    %cst_7 = arith.constant dense<0.000000e+00> : vector<32xf32>
    %9 = vector.multi_reduction <add>, %8, %cst_7 [1] : vector<32x128xf32> to vector<32xf32>
    %10 = vector.shape_cast %9 : vector<32xf32> to vector<32x1xf32>
    %cst_8 = arith.constant 1.280000e+02 : f32
    %11 = vector.broadcast %cst_8 : f32 to vector<32x1xf32>
    %12 = arith.divf %10, %11 : vector<32x1xf32>
    %13 = vector.broadcast %12 : vector<32x1xf32> to vector<32x128xf32>
    %14 = arith.subf %8, %13 : vector<32x128xf32>
    %15 = arith.mulf %14, %14 : vector<32x128xf32>
    %cst_9 = arith.constant dense<0.000000e+00> : vector<32xf32>
    %16 = vector.multi_reduction <add>, %15, %cst_9 [1] : vector<32x128xf32> to vector<32xf32>
    %17 = vector.shape_cast %16 : vector<32xf32> to vector<32x1xf32>
    %cst_10 = arith.constant 1.280000e+02 : f32
    %18 = vector.broadcast %cst_10 : f32 to vector<32x1xf32>
    %19 = arith.divf %17, %18 : vector<32x1xf32>
    %cst_11 = arith.constant 9.99999996E-13 : f32
    %20 = vector.broadcast %cst_11 : f32 to vector<32x1xf32>
    %21 = arith.addf %19, %20 : vector<32x1xf32>
    %22 = math.rsqrt %21 : vector<32x1xf32>
    %23 = vector.broadcast %22 : vector<32x1xf32> to vector<32x128xf32>
    %24 = arith.mulf %14, %23 : vector<32x128xf32>
    %c0_12 = arith.constant 0 : index
    %c0_13 = arith.constant 0 : index
    %25 = vector.load %arg5[%c0_12, %c0_13] : memref<1x128xf32, #tpu.memory_space<vmem>>, vector<1x128xf32>
    %26 = vector.broadcast %25 : vector<1x128xf32> to vector<32x128xf32>
    %27 = arith.mulf %24, %26 : vector<32x128xf32>
    %c0_14 = arith.constant 0 : index
    %c0_15 = arith.constant 0 : index
    %28 = vector.load %arg6[%c0_14, %c0_15] : memref<1x128xf32, #tpu.memory_space<vmem>>, vector<1x128xf32>
    %29 = vector.broadcast %28 : vector<1x128xf32> to vector<32x128xf32>
    %30 = arith.addf %27, %29 : vector<32x128xf32>
    %c0_16 = arith.constant 0 : index
    %c0_17 = arith.constant 0 : index
    %31 = vector.load %arg7[%c0_16, %c0_17] : memref<32x128xf32, #tpu.memory_space<vmem>>, vector<32x128xf32>
    tpu.vector_store %arg7[%c0_16, %c0_17], %30 {strides = array<i32>} : memref<32x128xf32, #tpu.memory_space<vmem>>, vector<32x128xf32>,
    return
  }
  func.func @transform_0(%arg0: i32) -> (i32, i32) {
    %c0_i32 = arith.constant 0 : i32
    %c0_i32_0 = arith.constant 0 : i32
    return %arg0, %c0_i32 : i32, i32
  }
  func.func @transform_1(%arg0: i32) -> (i32, i32) {
    %c0_i32 = arith.constant 0 : i32
    %c0_i32_0 = arith.constant 0 : i32
    %c0_i32_1 = arith.constant 0 : i32
    return %c0_i32, %c0_i32_0 : i32, i32
  }
  func.func @transform_2(%arg0: i32) -> (i32, i32) {
    %c0_i32 = arith.constant 0 : i32
    %c0_i32_0 = arith.constant 0 : i32
    %c0_i32_1 = arith.constant 0 : i32
    return %c0_i32, %c0_i32_0 : i32, i32
  }
  func.func @transform_3(%arg0: i32) -> (i32, i32) {
    %c0_i32 = arith.constant 0 : i32
    %c0_i32_0 = arith.constant 0 : i32
    return %arg0, %c0_i32 : i32, i32
  }
  func.func @transform_4(%arg0: i32) -> (i32, i32) {
    %c0_i32 = arith.constant 0 : i32
    %c0_i32_0 = arith.constant 0 : i32
    %c0_i32_1 = arith.constant 0 : i32
    return %c0_i32, %c0_i32_0 : i32, i32
  }
  func.func @transform_5(%arg0: i32) -> (i32, i32) {
    %c0_i32 = arith.constant 0 : i32
    %c0_i32_0 = arith.constant 0 : i32
    %c0_i32_1 = arith.constant 0 : i32
    return %c0_i32, %c0_i32_0 : i32, i32
  }
  func.func @transform_6(%arg0: i32) -> (i32, i32) {
    %c0_i32 = arith.constant 0 : i32
    %c0_i32_0 = arith.constant 0 : i32
    return %arg0, %c0_i32 : i32, i32
  }
}

module attributes {stable_mosaic.version = 11 : i64} {
  func.func @_head_kernel(%arg0: memref<2x128xf32, #tpu.memory_space<vmem>>, %arg1: memref<128x128xbf16, #tpu.memory_space<vmem>>, %arg2: memref<1x128xf32, #tpu.memory_space<vmem>>, %arg3: memref<128x1xbf16, #tpu.memory_space<vmem>>, %arg4: memref<1x1xf32, #tpu.memory_space<vmem>>, %arg5: memref<2x1xf32, #tpu.memory_space<vmem>>) attributes {dimension_semantics = [], scalar_prefetch = 0 : i64, scratch_operands = 0 : i64, tpu.core_type = #tpu.core_type<tc>} {
    %c0 = arith.constant 0 : index
    %c0_0 = arith.constant 0 : index
    %0 = vector.load %arg0[%c0, %c0_0] : memref<2x128xf32, #tpu.memory_space<vmem>>, vector<2x128xf32>
    %1 = arith.truncf %0 : vector<2x128xf32> to vector<2x128xbf16>
    %c0_1 = arith.constant 0 : index
    %c0_2 = arith.constant 0 : index
    %2 = vector.load %arg1[%c0_1, %c0_2] : memref<128x128xbf16, #tpu.memory_space<vmem>>, vector<128x128xbf16>
    %cst = arith.constant dense<0.000000e+00> : vector<2x128xf32>
    %3 = tpu.matmul %1, %2, %cst {dimension_numbers = #tpu.dot_dimension_numbers<[1], [0], [0], [1], [0, 0, 1, 1], [], []>} : vector<2x128xbf16>, vector<128x128xbf16>, vector<2x128xf32> -> vector<2x128xf32>
    %c0_3 = arith.constant 0 : index
    %c0_4 = arith.constant 0 : index
    %4 = vector.load %arg2[%c0_3, %c0_4] : memref<1x128xf32, #tpu.memory_space<vmem>>, vector<1x128xf32>
    %5 = vector.broadcast %4 : vector<1x128xf32> to vector<2x128xf32>
    %6 = arith.addf %3, %5 : vector<2x128xf32>
    %7 = math.tanh %6 : vector<2x128xf32>
    %8 = arith.truncf %7 : vector<2x128xf32> to vector<2x128xbf16>
    %c0_5 = arith.constant 0 : index
    %c0_6 = arith.constant 0 : index
    %9 = vector.load %arg3[%c0_5, %c0_6] : memref<128x1xbf16, #tpu.memory_space<vmem>>, vector<128x1xbf16>
    %cst_7 = arith.constant dense<0.000000e+00> : vector<2x1xf32>
    %10 = tpu.matmul %8, %9, %cst_7 {dimension_numbers = #tpu.dot_dimension_numbers<[1], [0], [0], [1], [0, 0, 1, 1], [], []>} : vector<2x128xbf16>, vector<128x1xbf16>, vector<2x1xf32> -> vector<2x1xf32>
    %c0_8 = arith.constant 0 : index
    %c0_9 = arith.constant 0 : index
    %11 = vector.load %arg4[%c0_8, %c0_9] : memref<1x1xf32, #tpu.memory_space<vmem>>, vector<1x1xf32>
    %12 = vector.broadcast %11 : vector<1x1xf32> to vector<2x1xf32>
    %13 = arith.addf %10, %12 : vector<2x1xf32>
    %c0_10 = arith.constant 0 : index
    %c0_11 = arith.constant 0 : index
    %14 = vector.load %arg5[%c0_10, %c0_11] : memref<2x1xf32, #tpu.memory_space<vmem>>, vector<2x1xf32>
    tpu.vector_store %arg5[%c0_10, %c0_11], %13 {strides = array<i32>} : memref<2x1xf32, #tpu.memory_space<vmem>>, vector<2x1xf32>,
    return
  }
}

</mosaic_0001>

<bundles_post_ra>
// kernel: bert_forward.12
= control target key start
LH: loop header
LB: loop body
LE: loop exit
PB: predicated region body
PF: predicated region fallthrough
CT: control target
= control target key end

     0   :  { %s153_s0 = inlined_call_operand.vmem [shape: f32[32,128], index: 0, kind: input, shape index: {}]   ;;  %s154_s1 = inlined_call_operand.vmem [shape: f32[1,128], index: 1, kind: input, shape index: {}]   ;;  %s155_s2 = inlined_call_operand.vmem [shape: f32[1,128], index: 2, kind: input, shape index: {}]   ;;  %s156_s3 = inlined_call_operand.vmem [shape: f32[32,128], index: 3, kind: output, shape index: {}]  }
   0x1   :  { %v14_v0 = vld [vmem:[%s153_s0] sm:$0xff]  ;;  %v16_v1 = vld [vmem:[%s153_s0 + $0x10] sm:$0xff]  ;;  %v15_v2 = vld [vmem:[%s153_s0 + $0x8] sm:$0xff] }
   0x2   :  { %18 = vadd.xlane.f32.xlu0 %v14_v0  ;;  %22 = vadd.xlane.f32.xlu1 %v16_v1  ;;  %v17_v3 = vld [vmem:[%s153_s0 + $0x18] sm:$0xff]  ;;  %v93_v33 = vld [vmem:[%s154_s1] ss:$0 sm:$0xff] }
   0x3   :  { %v94_v35 = vld [vmem:[%s155_s2] ss:$0 sm:$0xff] }
   0x6   :  { %20 = vadd.xlane.f32.xlu0 %v15_v2  ;;  %24 = vadd.xlane.f32.xlu1 %v17_v3 }
  0x8f   :  { %v19_v4 = vpop.xlane.xlu0 %18  ;;  %v23_v5 = vpop.xlane.xlu1 %22 }
  0x90   :  { %v27_v6 = vmul.f32 0.0078125, %v19_v4  ;;  %v29_v7 = vmul.f32 0.0078125, %v23_v5 }
  0x92   :  { %v31_v8 = vsub.f32 %v14_v0, %v27_v6  ;;  %v33_v9 = vsub.f32 %v16_v1, %v29_v7 }
  0x93   :  { %v21_v10 = vpop.xlane.xlu0 %20  ;;  %v25_v11 = vpop.xlane.xlu1 %24 }
  0x94   :  { %v28_v12 = vmul.f32 0.0078125, %v21_v10  ;;  %v35_v13 = vmul.f32 %v31_v8, %v31_v8  ;;  %v30_v14 = vmul.f32 0.0078125, %v25_v11  ;;  %v37_v17 = vmul.f32 %v33_v9, %v33_v9 }
  0x96   :  { %v32_v15 = vsub.f32 %v15_v2, %v28_v12  ;;  %39 = vadd.xlane.f32.xlu0 %v35_v13  ;;  %v34_v16 = vsub.f32 %v17_v3, %v30_v14 }
  0x98   :  { %v36_v18 = vmul.f32 %v32_v15, %v32_v15  ;;  %v38_v19 = vmul.f32 %v34_v16, %v34_v16 }
  0x9a   :  { %43 = vadd.xlane.f32.xlu0 %v37_v17  ;;  %41 = vadd.xlane.f32.xlu1 %v36_v18 }
  0x9e   :  { %45 = vadd.xlane.f32.xlu1 %v38_v19 }
 0x123   :  { %v40_v20 = vpop.xlane.xlu0 %39 }
 0x124   :  { %v47_v21 = vmul.f32 0.0078125, %v40_v20 }
 0x126   :  { %v51_v22 = vadd.f32 1e-12, %v47_v21 }
 0x127   :  { %v42_v23 = vpop.xlane.xlu1 %41  ;;  %v44_v24 = vpop.xlane.xlu0 %43 }
 0x128   :  { %95 = vrsqrt.f32 %v51_v22  ;;  %v48_v25 = vmul.f32 0.0078125, %v42_v23  ;;  %v49_v26 = vmul.f32 0.0078125, %v44_v24 }
 0x12a   :  { %v52_v27 = vadd.f32 1e-12, %v48_v25  ;;  %v53_v28 = vadd.f32 1e-12, %v49_v26 }
 0x12b   :  { %v46_v29 = vpop.xlane.xlu1 %45 }
 0x12c   :  { %97 = vrsqrt.f32 %v52_v27  ;;  %v50_v30 = vmul.f32 0.0078125, %v46_v29 }
 0x12d   :  { %99 = vrsqrt.f32 %v53_v28 }
 0x12e   :  { %v54_v31 = vadd.f32 1e-12, %v50_v30 }
 0x130   :  { %101 = vrsqrt.f32 %v54_v31 }
 0x132   :  { %v96_v32 = vpop.eup %95 }
 0x133   :  { %v59_v34 = vmul.f32 %v96_v32, %v31_v8 }
 0x135   :  { %v70_v36 = vmul.f32 %v93_v33, %v59_v34 }
 0x136   :  { %v98_v37 = vpop.eup %97 }
 0x137   :  { %v100_v38 = vpop.eup %99  ;;  %v81_v39 = vadd.f32 %v94_v35, %v70_v36  ;;  %v60_v40 = vmul.f32 %v98_v37, %v32_v15 }
 0x138   :  { %v61_v41 = vmul.f32 %v100_v38, %v33_v9 }
 0x139   :  { %85 = vst [vmem:[%s156_s3] sm:$0xff] %v81_v39  ;;  %v71_v42 = vmul.f32 %v93_v33, %v60_v40 }
 0x13a   :  { %v102_v43 = vpop.eup %101  ;;  %v72_v44 = vmul.f32 %v93_v33, %v61_v41 }
 0x13b   :  { %v82_v45 = vadd.f32 %v94_v35, %v71_v42  ;;  %v62_v46 = vmul.f32 %v102_v43, %v34_v16 }
 0x13c   :  { %v83_v47 = vadd.f32 %v94_v35, %v72_v44 }
 0x13d   :  { %86 = vst [vmem:[%s156_s3 + $0x8] sm:$0xff] %v82_v45  ;;  %v73_v48 = vmul.f32 %v93_v33, %v62_v46 }
 0x13e   :  { %87 = vst [vmem:[%s156_s3 + $0x10] sm:$0xff] %v83_v47 }
 0x13f   :  { %v84_v49 = vadd.f32 %v94_v35, %v73_v48 }
 0x141   :  { %88 = vst [vmem:[%s156_s3 + $0x18] sm:$0xff] %v84_v49 }

// kernel: bert_forward.13
= control target key start
LH: loop header
LB: loop body
LE: loop exit
PB: predicated region body
PF: predicated region fallthrough
CT: control target
= control target key end

     0   :  { %v403_v1 = vmov 0   ;;  %v55_v31 = vlaneseq  ;;  %s549_s1 = inlined_call_operand.vmem [shape: bf16[128,384], index: 1, kind: input, shape index: {}]   ;;  %s550_s0 = inlined_call_operand.vmem [shape: f32[32,128], index: 0, kind: input, shape index: {}]   ;;  %s551_s2 = inlined_call_operand.vmem [shape: f32[1,384], index: 2, kind: input, shape index: {}]   ;;  %s552_s3 = inlined_call_operand.vmem [shape: f32[32,384], index: 3, kind: output, shape index: {}]  }
   0x1   :  { %v371_v0 = vld [vmem:[%s549_s1 + $0x4] ss:$12 sps:$4 sm:$0xff]   ;;  %230 = vmatprep.mubr.bf16.mxu0 %v403_v1  ;;  %v373_v2 = vld [vmem:[%s549_s1] ss:$12 sps:$4 sm:$0xff]   ;;  %v374_v3 = vld [vmem:[%s549_s1 + $0x1c] ss:$12 sps:$4 sm:$0xff]  }
   0x2   :  { %198 = vmatprep.subr.bf16.mxu0 %v371_v0  ;;  %v376_v4 = vld [vmem:[%s549_s1 + $0x18] ss:$12 sps:$4 sm:$0xff]   ;;  %v377_v5 = vld [vmem:[%s549_s1 + $0x8] ss:$12 sps:$4 sm:$0xff]   ;;  %v381_v7 = vld [vmem:[%s549_s1 + $0x20] ss:$12 sps:$4 sm:$0xff]  }
   0x3   :  { %199 = vmatpush1.bf16.msra.mxu0 %v373_v2  ;;  %v378_v6 = vld [vmem:[%s549_s1 + $0x34] ss:$12 sps:$4 sm:$0xff]   ;;  %350 = vmatprep.subr.bf16.mxu1 %v377_v5  ;;  %v380_v8 = vld [vmem:[%s549_s1 + $0x30] ss:$12 sps:$4 sm:$0xff]   ;;  %v382_v9 = vld [vmem:[%s549_s1 + $0x4c] ss:$12 sps:$4 sm:$0xff]  }
   0x4   :  { %200 = vmatprep.subr.bf16.mxu0 %v374_v3  ;;  %351 = vmatpush3.bf16.msra.mxu1 %v377_v5  ;;  %v385_v10 = vld [vmem:[%s549_s1 + $0x38] ss:$12 sps:$4 sm:$0xff]   ;;  %v384_v11 = vld [vmem:[%s549_s1 + $0x48] ss:$12 sps:$4 sm:$0xff]   ;;  %v389_v12 = vld [vmem:[%s549_s1 + $0x50] ss:$12 sps:$4 sm:$0xff]  }
   0x5   :  { %352 = vmatprep.subr.bf16.mxu1 %v381_v7  ;;  %v386_v13 = vld [vmem:[%s549_s1 + $0x64] ss:$12 sps:$4 sm:$0xff]   ;;  %v388_v14 = vld [vmem:[%s549_s1 + $0x60] ss:$12 sps:$4 sm:$0xff]   ;;  %v393_v15 = vld [vmem:[%s549_s1 + $0x68] ss:$12 sps:$4 sm:$0xff]  }
   0x6   :  { %v390_v16 = vld [vmem:[%s549_s1 + $0x7c] ss:$12 sps:$4 sm:$0xff]   ;;  %v15_v17 = vld [vmem:[%s550_s0] sm:$0xff]  ;;  %v398_v25 = vld [vmem:[%s549_s1 + $0xac] ss:$12 sps:$4 sm:$0xff]   ;;  %v56_v32 = vshrl.u32 %v55_v31, 7 }
   0x7   :  { %201 = vmatpush1.bf16.msra.mxu0 %v376_v4  ;;  %v16_v18 = vld [vmem:[%s550_s0 + $0x8] sm:$0xff]  ;;  %v392_v19 = vld [vmem:[%s549_s1 + $0x78] ss:$12 sps:$4 sm:$0xff]   ;;  %v394_v22 = vld [vmem:[%s549_s1 + $0x94] ss:$12 sps:$4 sm:$0xff]  }
   0x8   :  { %202 = vmatprep.subr.bf16.mxu0 %v378_v6  ;;  %353 = vmatpush3.bf16.msra.mxu1 %v381_v7  ;;  %v397_v20 = vld [vmem:[%s549_s1 + $0x80] ss:$12 sps:$4 sm:$0xff]   ;;  %v19_v21 = vpack.c.bf16 %v16_v18, %v15_v17  ;;  %v396_v23 = vld [vmem:[%s549_s1 + $0x90] ss:$12 sps:$4 sm:$0xff]   ;;  %v401_v24 = vld [vmem:[%s549_s1 + $0x98] ss:$12 sps:$4 sm:$0xff]  }
   0x9   :  { %354 = vmatprep.subr.bf16.mxu1 %v385_v10  ;;  %v400_v26 = vld [vmem:[%s549_s1 + $0xa8] ss:$12 sps:$4 sm:$0xff]   ;;  %v402_v27 = vld [vmem:[%s549_s1 + $0xb0] ss:$12 sps:$4 sm:$0xff]   ;;  %v57_v33 = vsub.s32 0, %v56_v32  ;;  %v61_v35 = vsub.s32 1, %v56_v32 }
   0xa   :  { %366 = vmatprep.mubr.bf16.mxu1 %v19_v21  ;;  %v17_v28 = vld [vmem:[%s550_s0 + $0x10] sm:$0xff]  ;;  %v18_v29 = vld [vmem:[%s550_s0 + $0x18] sm:$0xff]  ;;  %v53_v34 = vld [vmem:[%s551_s2] sm:$0x7]  ;;  %v65_v36 = vsub.s32 2, %v56_v32 }
   0xb   :  { %203 = vmatpush1.bf16.msra.mxu0 %v380_v8  ;;  %v20_v30 = vpack.c.bf16 %v18_v29, %v17_v28  ;;  %v58_v37 = vrot.slane %v53_v34, %v57_v33  ;;  %v62_v38 = vrot.slane %v53_v34, %v61_v35 }
   0xc   :  { %204 = vmatprep.subr.bf16.mxu0 %v382_v9  ;;  %355 = vmatpush3.bf16.msra.mxu1 %v385_v10  ;;  %v66_v40 = vrot.slane %v53_v34, %v65_v36 }
   0xd   :  { %356 = vmatprep.subr.bf16.mxu1 %v389_v12 }
   0xf   :  { %205 = vmatpush1.bf16.msra.mxu0 %v384_v11 }
  0x10   :  { %206 = vmatprep.subr.bf16.mxu0 %v386_v13  ;;  %357 = vmatpush3.bf16.msra.mxu1 %v389_v12 }
  0x11   :  { %358 = vmatprep.subr.bf16.mxu1 %v393_v15 }
  0x13   :  { %207 = vmatpush1.bf16.msra.mxu0 %v388_v14 }
  0x14   :  { %208 = vmatprep.subr.bf16.mxu0 %v390_v16  ;;  %359 = vmatpush3.bf16.msra.mxu1 %v393_v15 }
  0x15   :  { %360 = vmatprep.subr.bf16.mxu1 %v397_v20 }
  0x17   :  { %209 = vmatpush1.bf16.msra.mxu0 %v392_v19 }
  0x18   :  { %210 = vmatprep.subr.bf16.mxu0 %v394_v22  ;;  %361 = vmatpush3.bf16.msra.mxu1 %v397_v20 }
  0x19   :  { %362 = vmatprep.subr.bf16.mxu1 %v401_v24 }
  0x1b   :  { %211 = vmatpush1.bf16.msra.mxu0 %v396_v23 }
  0x1c   :  { %212 = vmatprep.subr.bf16.mxu0 %v398_v25  ;;  %363 = vmatpush3.bf16.msra.mxu1 %v401_v24 }
  0x1d   :  { %364 = vmatprep.subr.bf16.mxu1 %v402_v27 }
  0x1f   :  { %213 = vmatpush1.bf16.msra.mxu0 %v400_v26 }
  0x20   :  { %365 = vmatpush3.bf16.msra.mxu1 %v402_v27 }
  0x22   :  { %231 = vmatmul.mubr.bf16.vlgmr.msra.gmra.mrb[0].mxu0 %v19_v21 }
  0x23   :  { %240 = vmatprep.mubr.bf16.mxu0 %v403_v1  ;;  %367 = vmatmul.mubr.bf16.vlgmr.msra.gmra.mrb[0].mxu1 %v20_v30 }
  0x2a   :  { %241 = vmatmul.mubr.bf16.gmra.mrb[4].mxu0 %v20_v30 }
  0xf5   :  { %v232_v39 = vpop.f32.mrb[0].mxu0 }
  0xf6   :  { %v233_v41 = vadd.f32 %v232_v39, %v58_v37  ;;  %v234_v42 = vpop.f32.mrb[1].mxu0  ;;  %v368_v47 = vpop.f32.mrb[0].mxu1 }
  0xf7   :  { %v235_v43 = vadd.f32 %v234_v42, %v62_v38  ;;  %v236_v44 = vpop.f32.mrb[2].mxu0  ;;  %v294_v49 = vadd.f32 %v368_v47, %v66_v40  ;;  %v285_v50 = vpop.f32.mrb[1].mxu1 }
  0xf8   :  { %300 = vst [vmem:[%s552_s3] sm:$0xff] %v233_v41  ;;  %v237_v45 = vadd.f32 %v236_v44, %v58_v37  ;;  %v238_v46 = vpop.f32.mrb[3].mxu0  ;;  %v286_v51 = vadd.f32 %v285_v50, %v66_v40  ;;  %v369_v52 = vpop.f32.mrb[2].mxu1 }
  0xf9   :  { %301 = vst [vmem:[%s552_s3 + $0x8] sm:$0xff] %v235_v43  ;;  %v239_v48 = vadd.f32 %v238_v46, %v62_v38  ;;  %308 = vst [vmem:[%s552_s3 + $0x40] sm:$0xff] %v294_v49  ;;  %v297_v53 = vadd.f32 %v369_v52, %v66_v40  ;;  %v288_v54 = vpop.f32.mrb[3].mxu1 }
  0xfa   :  { %303 = vst [vmem:[%s552_s3 + $0x18] sm:$0xff] %v237_v45  ;;  %302 = vst [vmem:[%s552_s3 + $0x10] sm:$0xff] %v286_v51  ;;  %v289_v55 = vadd.f32 %v288_v54, %v66_v40 }
  0xfb   :  { %304 = vst [vmem:[%s552_s3 + $0x20] sm:$0xff] %v239_v48  ;;  %311 = vst [vmem:[%s552_s3 + $0x58] sm:$0xff] %v297_v53 }
  0xfc   :  { %305 = vst [vmem:[%s552_s3 + $0x28] sm:$0xff] %v289_v55 }
  0xfd   :  { %v242_v56 = vpop.f32.mrb[4].mxu0 }
  0xfe   :  { %v243_v57 = vadd.f32 %v242_v56, %v58_v37  ;;  %v244_v58 = vpop.f32.mrb[5].mxu0 }
  0xff   :  { %v245_v59 = vadd.f32 %v244_v58, %v62_v38  ;;  %v246_v60 = vpop.f32.mrb[6].mxu0 }
 0x100   :  { %306 = vst [vmem:[%s552_s3 + $0x30] sm:$0xff] %v243_v57  ;;  %v247_v61 = vadd.f32 %v246_v60, %v58_v37  ;;  %v248_v62 = vpop.f32.mrb[7].mxu0 }
 0x101   :  { %307 = vst [vmem:[%s552_s3 + $0x38] sm:$0xff] %v245_v59  ;;  %v249_v63 = vadd.f32 %v248_v62, %v62_v38 }
 0x102   :  { %309 = vst [vmem:[%s552_s3 + $0x48] sm:$0xff] %v247_v61 }
 0x103   :  { %310 = vst [vmem:[%s552_s3 + $0x50] sm:$0xff] %v249_v63 }

// kernel: bert_forward.14
= control target key start
LH: loop header
LB: loop body
LE: loop exit
PB: predicated region body
PF: predicated region fallthrough
CT: control target
= control target key end

     0   :  { %s1035_s15 = smov 0   ;;  %s1153_s0 = inlined_call_operand.vmem [shape: f32[2,4,16,32], index: 0, kind: input, shape index: {}]   ;;  %s1154_s1 = inlined_call_operand.vmem [shape: f32[2,4,16,32], index: 1, kind: input, shape index: {}]   ;;  %s1155_s2 = inlined_call_operand.vmem [shape: f32[2,4,16,32], index: 2, kind: input, shape index: {}]   ;;  %s1156_s3 = inlined_call_operand.vmem [shape: f32[2,1,16], index: 3, kind: input, shape index: {}]   ;;  %s1157_s4 = inlined_call_operand.vmem [shape: f32[2,4,16,32], index: 4, kind: output, shape index: {}]  }
   0x1 LB: > { %s866_s16 = sadd.s32 4294967295, %s1006_s15   ;;  %p870_p0 = scmp.ge.s32.totalorder %s1006_s15, 1  ;;  %s1006_s15 = sphi %s1035_s15, %s14_s15  }
   0x2   : > { %p190_p1 = scmp.lt.s32.totalorder %s1006_s15, 3 }
   0x4   : > { %p191_p2 = pnand %p870_p0, %p190_p1 }
   0x5   : > { %p229_p3 = scmp.lt.s32.totalorder (!%p191_p2), %s866_s16, 1  ;;  %v1008_v0 = vmov (!%p191_p2), 0.0   ;;  %vm1009_vm0 = vmmov (!%p191_p2), 0   ;;  %vm289_vm1 = vcmask (!%p191_p2), 261120   ;;  %vm501_vm2 = vcmask (!%p191_p2), 130048  }
   0x6   : > { %194 = sbr.rel (%p191_p2) target bundleno = 790 (0x316), region = 36  ;;  %910 = vmatprep.subr.bf16.mxu0 (!%p191_p2), %v1008_v0  ;;  %916 = vmatprep.subr.bf16.mxu1 (!%p191_p2), %v1008_v0 }
   0x7   : > { %912 = vmatprep.mubr.msk.bf16.mxu0 (!%p191_p2), %vm1009_vm0, %v1008_v0  ;;  %918 = vmatprep.mubr.msk.bf16.mxu1 (!%p191_p2), %vm1009_vm0, %v1008_v0 }
   0xd   : > { %s1159_s16 = smov (!%p229_p3, %s866_s16), 1 }
   0xe   : > { %s1052_s17 = sshll.u32 %s1159_s16, 6  ;;  %s246_s26 = scalar_lea.vmem %s1156_s3, %s1159_s16 }
   0xf   : > { %s238_s20 = scalar_lea.vmem %s1154_s1, %s1052_s17  ;;  %s233_s23 = scalar_lea.vmem %s1153_s0, %s1052_s17  ;;  %v883_v30 = vld [vmem:[%s246_s26] ss:$0 sm:$0xff] }
  0x10   : > { %v265_v1 = vld [vmem:[%s238_s20] sm:$0xff]  ;;  %v266_v2 = vld [vmem:[%s238_s20 + $0x8] sm:$0xff]  ;;  %v267_v3 = vld [vmem:[%s238_s20 + $0x10] sm:$0xff]  ;;  %s1115_s29 = scalar_lea.vmem %s1155_s2, %s1052_s17  ;;  %s251_s6 = scalar_lea.vmem %s1157_s4, %s1052_s17 }
  0x11   : > { %v273_v4 = vpack.c.bf16 %v266_v2, %v265_v1  ;;  %v268_v5 = vld [vmem:[%s238_s20 + $0x18] sm:$0xff]  ;;  %v269_v7 = vld [vmem:[%s238_s20 + $0x20] sm:$0xff]  ;;  %v270_v9 = vld [vmem:[%s238_s20 + $0x28] sm:$0xff] }
  0x12   : > { %v274_v6 = vpack.c.bf16 %v268_v5, %v267_v3  ;;  %v271_v10 = vld [vmem:[%s238_s20 + $0x30] sm:$0xff]  ;;  %v272_v11 = vld [vmem:[%s238_s20 + $0x38] sm:$0xff]  ;;  %v253_v13 = vld [vmem:[%s233_s23] sm:$0xff]  ;;  %v275_v17 = vpack.c.bf16 %v270_v9, %v269_v7 }
  0x13   : > { %v294_v8 = vsel %vm289_vm1, %v273_v4, 0  ;;  %v254_v14 = vld [vmem:[%s233_s23 + $0x8] sm:$0xff]  ;;  %v255_v15 = vld [vmem:[%s233_s23 + $0x10] sm:$0xff]  ;;  %v256_v16 = vld [vmem:[%s233_s23 + $0x18] sm:$0xff]  ;;  %v276_v18 = vpack.c.bf16 %v272_v11, %v271_v10 }
  0x14   : > { %911 = vmatpush3.bf16.xpose.msra.mxu0 %v294_v8  ;;  %v341_v12 = vsel %vm289_vm1, %v274_v6, 0  ;;  %v261_v19 = vpack.c.bf16 %v254_v14, %v253_v13  ;;  %v262_v20 = vpack.c.bf16 %v256_v16, %v255_v15  ;;  %v388_v21 = vsel %vm289_vm1, %v275_v17, 0  ;;  %v257_v23 = vld [vmem:[%s233_s23 + $0x20] sm:$0xff]  ;;  %v258_v24 = vld [vmem:[%s233_s23 + $0x28] sm:$0xff]  ;;  %v259_v25 = vld [vmem:[%s233_s23 + $0x30] sm:$0xff] }
  0x15   : > { %917 = vmatpush3.bf16.xpose.msra.mxu1 %v341_v12  ;;  %922 = vmatprep.subr.bf16.mxu0 %v1008_v0  ;;  %v435_v22 = vsel %vm289_vm1, %v276_v18, 0  ;;  %v260_v26 = vld [vmem:[%s233_s23 + $0x38] sm:$0xff]  ;;  %v263_v27 = vpack.c.bf16 %v258_v24, %v257_v23 }
  0x16   : > { %928 = vmatprep.subr.bf16.mxu1 %v1008_v0  ;;  %v264_v28 = vpack.c.bf16 %v260_v26, %v259_v25 }
  0x1b   : > { %913 = vmatmul.mubr.msk.bf16.vlgmr.msra.gmra.mrb[0].mxu0 %vm289_vm1, %v261_v19 }
  0x1c   : > { %919 = vmatmul.mubr.msk.bf16.vlgmr.msra.gmra.mrb[0].mxu1 %vm289_vm1, %v262_v20  ;;  %923 = vmatpush3.bf16.xpose.msra.mxu0 %v388_v21 }
  0x1d   : > { %929 = vmatpush3.bf16.xpose.msra.mxu1 %v435_v22  ;;  %924 = vmatprep.mubr.msk.bf16.mxu0 %vm1009_vm0, %v1008_v0 }
  0x1e   : > { %930 = vmatprep.mubr.msk.bf16.mxu1 %vm1009_vm0, %v1008_v0  ;;  %934 = vmatprep.subr.bf16.mxu0 %v1008_v0 }
  0x1f   : > { %940 = vmatprep.subr.bf16.mxu1 %v1008_v0 }
  0x23   : > { %925 = vmatmul.mubr.msk.bf16.vlgmr.msra.gmra.mrb[4].mxu0 %vm289_vm1, %v263_v27 }
  0x24   : > { %931 = vmatmul.mubr.msk.bf16.vlgmr.msra.gmra.mrb[4].mxu1 %vm289_vm1, %v264_v28  ;;  %936 = vmatprep.mubr.msk.bf16.mxu0 %vm1009_vm0, %v1008_v0 }
  0x25   : > { %942 = vmatprep.mubr.msk.bf16.mxu1 %vm1009_vm0, %v1008_v0 }
  0xee   : > { %v330_v29 = vpop.f32.mrb[0].mxu0 }
  0xef   : > { %v478_v31 = vmul.f32 0.17677669, %v330_v29  ;;  %v377_v32 = vpop.f32.mrb[0].mxu1  ;;  %v914_v33 = vpop.f32.mrb[1].mxu0 }
  0xf0   : > { %v480_v34 = vmul.f32 0.17677669, %v377_v32  ;;  %v333_v35 = vpop.f32.mrb[2].mxu0  ;;  %v920_v36 = vpop.f32.mrb[1].mxu1 }
  0xf1   : > { %v479_v37 = vmul.f32 0.17677669, %v333_v35  ;;  %v915_v38 = vpop.f32.mrb[3].mxu0  ;;  %v380_v39 = vpop.f32.mrb[2].mxu1  ;;  %v493_v40 = vadd.f32 %v883_v30, %v478_v31 }
  0xf2   : > { %v481_v41 = vmul.f32 0.17677669, %v380_v39  ;;  %v921_v42 = vpop.f32.mrb[3].mxu1  ;;  %v495_v43 = vadd.f32 %v883_v30, %v480_v34 }
  0xf3   : > { %v502_v44 = vsel %vm501_vm2, %v493_v40, -inf  ;;  %v494_v45 = vadd.f32 %v883_v30, %v479_v37 }
  0xf4   : > { %v508_v46 = vsel %vm501_vm2, %v495_v43, -inf  ;;  %503 = vmax.xlane.f32.xlu0 %v502_v44  ;;  %v496_v47 = vadd.f32 %v883_v30, %v481_v41 }
  0xf5   : > { %509 = vmax.xlane.f32.xlu1 %v508_v46  ;;  %v505_v52 = vsel %vm501_vm2, %v494_v45, -inf }
  0xf6   : > { %v424_v48 = vpop.f32.mrb[4].mxu0  ;;  %v511_v49 = vsel %vm501_vm2, %v496_v47, -inf }
  0xf7   : > { %v482_v50 = vmul.f32 0.17677669, %v424_v48  ;;  %v926_v51 = vpop.f32.mrb[5].mxu0  ;;  %v471_v53 = vpop.f32.mrb[4].mxu1  ;;  %v278_v48 = vld [vmem:[%s1115_s29 + $0x8] sm:$0xff] }
  0xf8   : > { %506 = vmax.xlane.f32.xlu0 %v505_v52  ;;  %v427_v54 = vpop.f32.mrb[6].mxu0  ;;  %v484_v55 = vmul.f32 0.17677669, %v471_v53  ;;  %v932_v56 = vpop.f32.mrb[5].mxu1  ;;  %v280_v51 = vld [vmem:[%s1115_s29 + $0x18] sm:$0xff] }
  0xf9   : > { %512 = vmax.xlane.f32.xlu1 %v511_v49  ;;  %v483_v57 = vmul.f32 0.17677669, %v427_v54  ;;  %v927_v58 = vpop.f32.mrb[7].mxu0  ;;  %v474_v59 = vpop.f32.mrb[6].mxu1  ;;  %v497_v60 = vadd.f32 %v883_v30, %v482_v50  ;;  %v279_v50 = vld [vmem:[%s1115_s29 + $0x10] sm:$0xff] }
  0xfa   : > { %v485_v61 = vmul.f32 0.17677669, %v474_v59  ;;  %v933_v62 = vpop.f32.mrb[7].mxu1  ;;  %v499_v63 = vadd.f32 %v883_v30, %v484_v55  ;;  %v286_v52 = vpack.c.bf16 %v280_v51, %v279_v50 }
  0xfb   : > { %v514_v1 = vsel %vm501_vm2, %v497_v60, -inf  ;;  %v498_v2 = vadd.f32 %v883_v30, %v483_v57  ;;  %v282_v62 = vld [vmem:[%s1115_s29 + $0x28] sm:$0xff] }
  0xfc   : > { %515 = vmax.xlane.f32.xlu0 %v514_v1  ;;  %v500_v3 = vadd.f32 %v883_v30, %v485_v61  ;;  %v520_v5 = vsel %vm501_vm2, %v499_v63, -inf  ;;  %941 = vmatpush3.bf16.msra.mxu1 %v286_v52  ;;  %v281_v61 = vld [vmem:[%s1115_s29 + $0x20] sm:$0xff] }
  0xfd   : > { %v517_v4 = vsel %vm501_vm2, %v498_v2, -inf  ;;  %952 = vmatprep.subr.bf16.mxu1 %v1008_v0 }
  0xfe   : > { %518 = vmax.xlane.f32.xlu1 %v517_v4  ;;  %v523_v6 = vsel %vm501_vm2, %v500_v3, -inf }
 0x100   : > { %521 = vmax.xlane.f32.xlu0 %v520_v5  ;;  %v287_v5 = vpack.c.bf16 %v282_v62, %v281_v61 }
 0x102   : > { %524 = vmax.xlane.f32.xlu1 %v523_v6 }
 0x181   : > { %v504_v7 = vpop.xlane.xlu0 %503 }
 0x182   : > { %v510_v8 = vpop.xlane.xlu1 %509  ;;  %v526_v9 = vsub.f32 %v493_v40, %v504_v7  ;;  %v283_v7 = vld [vmem:[%s1115_s29 + $0x30] sm:$0xff] }
 0x183   : > { %v528_v10 = vsub.f32 %v495_v43, %v510_v8  ;;  %v284_v8 = vld [vmem:[%s1115_s29 + $0x38] sm:$0xff] }
 0x184   : > { %v534_v11 = vmul.f32 1.442695, %v526_v9 }
 0x185   : > { %v538_v12 = vmul.f32 1.442695, %v528_v10  ;;  %v507_v13 = vpop.xlane.xlu0 %506 }
 0x186   : > { %968 = vpow2.f32 %v534_v11  ;;  %v513_v14 = vpop.xlane.xlu1 %512  ;;  %v527_v15 = vsub.f32 %v494_v45, %v507_v13  ;;  %v288_v13 = vpack.c.bf16 %v284_v8, %v283_v7 }
 0x187   : > { %v529_v16 = vsub.f32 %v496_v47, %v513_v14  ;;  %970 = vpow2.f32 %v538_v12  ;;  %v277_v47 = vld [vmem:[%s1115_s29] sm:$0xff] }
 0x188   : > { %v536_v17 = vmul.f32 1.442695, %v527_v15  ;;  %v285_v49 = vpack.c.bf16 %v278_v48, %v277_v47 }
 0x189   : > { %v540_v18 = vmul.f32 1.442695, %v529_v16  ;;  %v516_v19 = vpop.xlane.xlu0 %515 }
 0x18a   : > { %972 = vpow2.f32 %v536_v17  ;;  %v530_v20 = vsub.f32 %v497_v60, %v516_v19  ;;  %935 = vmatpush3.bf16.msra.mxu0 %v285_v49 }
 0x18b   : > { %v519_v21 = vpop.xlane.xlu1 %518  ;;  %974 = vpow2.f32 %v540_v18  ;;  %946 = vmatprep.subr.bf16.mxu0 %v1008_v0 }
 0x18c   : > { %v542_v22 = vmul.f32 1.442695, %v530_v20  ;;  %v531_v23 = vsub.f32 %v498_v2, %v519_v21 }
 0x18d   : > { %v522_v24 = vpop.xlane.xlu0 %521 }
 0x18e   : > { %976 = vpow2.f32 %v542_v22  ;;  %v544_v25 = vmul.f32 1.442695, %v531_v23  ;;  %v532_v26 = vsub.f32 %v499_v63, %v522_v24 }
 0x18f   : > { %v525_v27 = vpop.xlane.xlu1 %524 }
 0x190   : > { %v969_v28 = vpop.eup %968  ;;  %978 = vpow2.f32 %v544_v25  ;;  %v546_v29 = vmul.f32 1.442695, %v532_v26  ;;  %v533_v30 = vsub.f32 %v500_v3, %v525_v27 }
 0x191   : > { %v550_v31 = vsel %vm501_vm2, %v969_v28, 0.0  ;;  %v1095_v32 = vpop.eup %970 }
 0x192   : > { %980 = vpow2.f32 %v546_v29  ;;  %v548_v33 = vmul.f32 1.442695, %v533_v30  ;;  %551 = vadd.xlane.f32.xlu0 %v550_v31  ;;  %v556_v35 = vsel %vm501_vm2, %v1095_v32, 0.0 }
 0x194   : > { %v973_v34 = vpop.eup %972  ;;  %982 = vpow2.f32 %v548_v33 }
 0x195   : > { %v553_v36 = vsel %vm501_vm2, %v973_v34, 0.0  ;;  %v975_v37 = vpop.eup %974 }
 0x196   : > { %557 = vadd.xlane.f32.xlu0 %v556_v35  ;;  %554 = vadd.xlane.f32.xlu1 %v553_v36  ;;  %v559_v40 = vsel %vm501_vm2, %v975_v37, 0.0 }
 0x198   : > { %v1100_v38 = vpop.eup %976 }
 0x199   : > { %v562_v39 = vsel %vm501_vm2, %v1100_v38, 0.0 }
 0x19a   : > { %v979_v41 = vpop.eup %978  ;;  %563 = vadd.xlane.f32.xlu0 %v562_v39  ;;  %560 = vadd.xlane.f32.xlu1 %v559_v40 }
 0x19b   : > { %v565_v44 = vsel %vm501_vm2, %v979_v41, 0.0 }
 0x19c   : > { %v1105_v42 = vpop.eup %980 }
 0x19d   : > { %v568_v43 = vsel %vm501_vm2, %v1105_v42, 0.0 }
 0x19e   : > { %v983_v45 = vpop.eup %982  ;;  %569 = vadd.xlane.f32.xlu0 %v568_v43  ;;  %566 = vadd.xlane.f32.xlu1 %v565_v44 }
 0x19f   : > { %v571_v46 = vsel %vm501_vm2, %v983_v45, 0.0 }
 0x1a2   : > { %572 = vadd.xlane.f32.xlu1 %v571_v46 }
 0x21f   : > { %v552_v53 = vpop.xlane.xlu0 %551 }
 0x220   : > { %984 = vrcp.f32 %v552_v53 }
 0x223   : > { %v558_v54 = vpop.xlane.xlu0 %557  ;;  %v555_v55 = vpop.xlane.xlu1 %554 }
 0x224   : > { %986 = vrcp.f32 %v555_v55 }
 0x225   : > { %988 = vrcp.f32 %v558_v54 }
 0x227   : > { %v564_v56 = vpop.xlane.xlu0 %563  ;;  %v561_v57 = vpop.xlane.xlu1 %560 }
 0x228   : > { %990 = vrcp.f32 %v561_v57 }
 0x229   : > { %992 = vrcp.f32 %v564_v56 }
 0x22a   : > { %v985_v60 = vpop.eup %984 }
 0x22b   : > { %v570_v58 = vpop.xlane.xlu0 %569  ;;  %v567_v59 = vpop.xlane.xlu1 %566  ;;  %v582_v2 = vmul.f32 %v985_v60, %v969_v28 }
 0x22c   : > { %994 = vrcp.f32 %v567_v59 }
 0x22d   : > { %996 = vrcp.f32 %v570_v58 }
 0x22e   : > { %v987_v63 = vpop.eup %986 }
 0x22f   : > { %v573_v1 = vpop.xlane.xlu1 %572  ;;  %v583_v3 = vmul.f32 %v987_v63, %v973_v34  ;;  %v989_v4 = vpop.eup %988 }
 0x230   : > { %998 = vrcp.f32 %v573_v1  ;;  %v584_v10 = vmul.f32 %v989_v4, %v1095_v32 }
 0x231   : > { %v590_v6 = vpack.c.bf16 %v583_v3, %v582_v2 }
 0x232   : > { %v991_v9 = vpop.eup %990 }
 0x233   : > { %v585_v11 = vmul.f32 %v991_v9, %v975_v37  ;;  %937 = vmatmul.mubr.msk.bf16.vlgmr.msra.gmra.mrb[8].mxu0 %vm501_vm2, %v590_v6  ;;  %v993_v12 = vpop.eup %992 }
 0x234   : > { %947 = vmatpush3.bf16.msra.mxu0 %v287_v5  ;;  %948 = vmatprep.mubr.msk.bf16.mxu0 %vm1009_vm0, %v1008_v0  ;;  %v586_v17 = vmul.f32 %v993_v12, %v1100_v38 }
 0x235   : > { %v591_v14 = vpack.c.bf16 %v585_v11, %v584_v10 }
 0x236   : > { %v995_v15 = vpop.eup %994 }
 0x237   : > { %v997_v16 = vpop.eup %996  ;;  %v587_v18 = vmul.f32 %v995_v15, %v979_v41  ;;  %943 = vmatmul.mubr.msk.bf16.vlgmr.msra.gmra.mrb[8].mxu1 %vm501_vm2, %v591_v14 }
 0x238   : > { %953 = vmatpush3.bf16.msra.mxu1 %v288_v13  ;;  %954 = vmatprep.mubr.msk.bf16.mxu1 %vm1009_vm0, %v1008_v0  ;;  %v588_v21 = vmul.f32 %v997_v16, %v1105_v42 }
 0x239   : > { %v592_v20 = vpack.c.bf16 %v587_v18, %v586_v17 }
 0x23a   : > { %v999_v19 = vpop.eup %998 }
 0x23b   : > { %v589_v22 = vmul.f32 %v999_v19, %v983_v45  ;;  %949 = vmatmul.mubr.msk.bf16.vlgmr.msra.gmra.mrb[12].mxu0 %vm501_vm2, %v592_v20 }
 0x23d   : > { %v593_v23 = vpack.c.bf16 %v589_v22, %v588_v21 }
 0x23f   : > { %955 = vmatmul.mubr.msk.bf16.vlgmr.msra.gmra.mrb[12].mxu1 %vm501_vm2, %v593_v23 }
 0x306   : > { %v631_v24 = vpop.f32.mrb[8].mxu0 }
 0x307   : > { %770 = vst.msk [vmem:[%s251_s6] sm:$0xff] %vm289_vm1, %v631_v24  ;;  %v938_v25 = vpop.f32.mrb[9].mxu0 }
 0x308   : > { %v634_v26 = vpop.f32.mrb[10].mxu0 }
 0x309   : > { %771 = vst.msk [vmem:[%s251_s6 + $0x8] sm:$0xff] %vm289_vm1, %v634_v26  ;;  %v939_v0 = vpop.f32.mrb[11].mxu0 }
 0x30a   : > { %v675_v27 = vpop.f32.mrb[8].mxu1 }
 0x30b   : > { %772 = vst.msk [vmem:[%s251_s6 + $0x10] sm:$0xff] %vm289_vm1, %v675_v27  ;;  %v944_v28 = vpop.f32.mrb[9].mxu1 }
 0x30c   : > { %v678_v29 = vpop.f32.mrb[10].mxu1 }
 0x30d   : > { %773 = vst.msk [vmem:[%s251_s6 + $0x18] sm:$0xff] %vm289_vm1, %v678_v29  ;;  %v945_v30 = vpop.f32.mrb[11].mxu1 }
 0x30e   : > { %v719_v31 = vpop.f32.mrb[12].mxu0 }
 0x30f   : > { %774 = vst.msk [vmem:[%s251_s6 + $0x20] sm:$0xff] %vm289_vm1, %v719_v31  ;;  %v950_v32 = vpop.f32.mrb[13].mxu0 }
 0x310   : > { %v722_v33 = vpop.f32.mrb[14].mxu0 }
 0x311   : > { %775 = vst.msk [vmem:[%s251_s6 + $0x28] sm:$0xff] %vm289_vm1, %v722_v33  ;;  %v951_v34 = vpop.f32.mrb[15].mxu0 }
 0x312   : > { %v763_v35 = vpop.f32.mrb[12].mxu1 }
 0x313   : > { %776 = vst.msk [vmem:[%s251_s6 + $0x30] sm:$0xff] %vm289_vm1, %v763_v35  ;;  %v956_v36 = vpop.f32.mrb[13].mxu1 }
 0x314   : > { %v766_v37 = vpop.f32.mrb[14].mxu1 }
 0x315   : > { %777 = vst.msk [vmem:[%s251_s6 + $0x38] sm:$0xff] %vm289_vm1, %v766_v37  ;;  %v957_v38 = vpop.f32.mrb[15].mxu1 }
 0x316 PF: > { %s14_s15 = sadd.s32 1, %s1006_s15  }
 0x317   : > { %p11_p4 = scmp.ge.s32.totalorder %s14_s15, 4  }
 0x319   :  { %13 = sbr.rel (!%p11_p4) target bundleno = 1 (0x1), region = 75 }

// kernel: bert_forward.15
= control target key start
LH: loop header
LB: loop body
LE: loop exit
PB: predicated region body
PF: predicated region fallthrough
CT: control target
= control target key end

     0   :  { %s394_s1 = inlined_call_operand.vmem [shape: bf16[128,128], index: 1, kind: input, shape index: {}]   ;;  %s395_s0 = inlined_call_operand.vmem [shape: f32[32,128], index: 0, kind: input, shape index: {}]   ;;  %s396_s2 = inlined_call_operand.vmem [shape: f32[1,128], index: 2, kind: input, shape index: {}]   ;;  %s397_s3 = inlined_call_operand.vmem [shape: f32[32,128], index: 3, kind: input, shape index: {}]   ;;  %s398_s4 = inlined_call_operand.vmem [shape: f32[1,128], index: 4, kind: input, shape index: {}]   ;;  %s399_s5 = inlined_call_operand.vmem [shape: f32[1,128], index: 5, kind: input, shape index: {}]   ;;  %s400_s6 = inlined_call_operand.vmem [shape: f32[32,128], index: 6, kind: output, shape index: {}]  }
   0x1   :  { %v274_v0 = vld [vmem:[%s394_s1] sm:$0xff]   ;;  %v275_v1 = vld [vmem:[%s394_s1 + $0x8] sm:$0xff]   ;;  %v276_v2 = vld [vmem:[%s394_s1 + $0x10] sm:$0xff]  }
   0x2   :  { %254 = vmatprep.subr.bf16.mxu0 %v274_v0  ;;  %v277_v3 = vld [vmem:[%s394_s1 + $0x18] sm:$0xff]   ;;  %v24_v4 = vld [vmem:[%s395_s0] sm:$0xff]  ;;  %v25_v5 = vld [vmem:[%s395_s0 + $0x8] sm:$0xff] }
   0x3   :  { %255 = vmatpush3.bf16.msra.mxu0 %v274_v0  ;;  %v28_v6 = vpack.c.bf16 %v25_v5, %v24_v4  ;;  %v278_v7 = vld [vmem:[%s394_s1 + $0x20] sm:$0xff]   ;;  %v279_v8 = vld [vmem:[%s394_s1 + $0x28] sm:$0xff]   ;;  %v280_v9 = vld [vmem:[%s394_s1 + $0x30] sm:$0xff]  }
   0x4   :  { %256 = vmatprep.subr.bf16.mxu0 %v275_v1  ;;  %v281_v10 = vld [vmem:[%s394_s1 + $0x38] sm:$0xff]   ;;  %v26_v11 = vld [vmem:[%s395_s0 + $0x10] sm:$0xff]  ;;  %v233_v14 = vld [vmem:[%s396_s2] ss:$0 sm:$0xff] }
   0x5   :  { %270 = vmatprep.mubr.bf16.mxu0 %v28_v6  ;;  %v27_v12 = vld [vmem:[%s395_s0 + $0x18] sm:$0xff]  ;;  %v152_v16 = vld [vmem:[%s397_s3 + $0x10] sm:$0xff]  ;;  %v150_v19 = vld [vmem:[%s397_s3] sm:$0xff] }
   0x6   :  { %v29_v13 = vpack.c.bf16 %v27_v12, %v26_v11  ;;  %v153_v27 = vld [vmem:[%s397_s3 + $0x18] sm:$0xff]  ;;  %v151_v28 = vld [vmem:[%s397_s3 + $0x8] sm:$0xff]  ;;  %v242_v60 = vld [vmem:[%s398_s4] ss:$0 sm:$0xff] }
   0x7   :  { %257 = vmatpush3.bf16.msra.mxu0 %v275_v1  ;;  %v243_v62 = vld [vmem:[%s399_s5] ss:$0 sm:$0xff] }
   0x8   :  { %258 = vmatprep.subr.bf16.mxu0 %v276_v2 }
   0xb   :  { %259 = vmatpush3.bf16.msra.mxu0 %v276_v2 }
   0xc   :  { %260 = vmatprep.subr.bf16.mxu0 %v277_v3 }
   0xf   :  { %261 = vmatpush3.bf16.msra.mxu0 %v277_v3 }
  0x10   :  { %262 = vmatprep.subr.bf16.mxu0 %v278_v7 }
  0x13   :  { %263 = vmatpush3.bf16.msra.mxu0 %v278_v7 }
  0x14   :  { %264 = vmatprep.subr.bf16.mxu0 %v279_v8 }
  0x17   :  { %265 = vmatpush3.bf16.msra.mxu0 %v279_v8 }
  0x18   :  { %266 = vmatprep.subr.bf16.mxu0 %v280_v9 }
  0x1b   :  { %267 = vmatpush3.bf16.msra.mxu0 %v280_v9 }
  0x1c   :  { %268 = vmatprep.subr.bf16.mxu0 %v281_v10 }
  0x1f   :  { %269 = vmatpush3.bf16.msra.mxu0 %v281_v10 }
  0x22   :  { %271 = vmatmul.mubr.bf16.vlgmr.msra.gmra.mrb[0].mxu0 %v29_v13 }
  0xf5   :  { %v272_v15 = vpop.f32.mrb[0].mxu0 }
  0xf6   :  { %v144_v17 = vadd.f32 %v272_v15, %v233_v14  ;;  %v135_v18 = vpop.f32.mrb[1].mxu0 }
  0xf7   :  { %v136_v20 = vadd.f32 %v233_v14, %v135_v18  ;;  %v273_v21 = vpop.f32.mrb[2].mxu0 }
  0xf8   :  { %v147_v22 = vadd.f32 %v273_v21, %v233_v14  ;;  %v138_v23 = vpop.f32.mrb[3].mxu0  ;;  %v156_v24 = vadd.f32 %v152_v16, %v144_v17 }
  0xf9   :  { %v139_v25 = vadd.f32 %v233_v14, %v138_v23  ;;  %v154_v26 = vadd.f32 %v150_v19, %v136_v20 }
  0xfa   :  { %162 = vadd.xlane.f32.xlu1 %v156_v24  ;;  %v157_v29 = vadd.f32 %v153_v27, %v147_v22 }
  0xfb   :  { %158 = vadd.xlane.f32.xlu0 %v154_v26  ;;  %v155_v30 = vadd.f32 %v151_v28, %v139_v25 }
  0xfe   :  { %164 = vadd.xlane.f32.xlu1 %v157_v29 }
  0xff   :  { %160 = vadd.xlane.f32.xlu0 %v155_v30 }
 0x187   :  { %v163_v31 = vpop.xlane.xlu1 %162 }
 0x188   :  { %v159_v32 = vpop.xlane.xlu0 %158  ;;  %v169_v33 = vmul.f32 0.0078125, %v163_v31 }
 0x189   :  { %v167_v34 = vmul.f32 0.0078125, %v159_v32 }
 0x18a   :  { %v173_v38 = vsub.f32 %v156_v24, %v169_v33 }
 0x18b   :  { %v171_v35 = vsub.f32 %v154_v26, %v167_v34  ;;  %v165_v36 = vpop.xlane.xlu1 %164 }
 0x18c   :  { %v161_v37 = vpop.xlane.xlu0 %160  ;;  %v170_v39 = vmul.f32 0.0078125, %v165_v36  ;;  %v177_v44 = vmul.f32 %v173_v38, %v173_v38 }
 0x18d   :  { %v168_v40 = vmul.f32 0.0078125, %v161_v37  ;;  %v175_v41 = vmul.f32 %v171_v35, %v171_v35 }
 0x18e   :  { %v174_v43 = vsub.f32 %v157_v29, %v170_v39 }
 0x18f   :  { %v172_v42 = vsub.f32 %v155_v30, %v168_v40  ;;  %179 = vadd.xlane.f32.xlu0 %v175_v41 }
 0x190   :  { %v178_v46 = vmul.f32 %v174_v43, %v174_v43 }
 0x191   :  { %v176_v45 = vmul.f32 %v172_v42, %v172_v42 }
 0x193   :  { %183 = vadd.xlane.f32.xlu0 %v177_v44  ;;  %181 = vadd.xlane.f32.xlu1 %v176_v45 }
 0x197   :  { %185 = vadd.xlane.f32.xlu1 %v178_v46 }
 0x21c   :  { %v180_v47 = vpop.xlane.xlu0 %179 }
 0x21d   :  { %v187_v48 = vmul.f32 0.0078125, %v180_v47 }
 0x21f   :  { %v191_v49 = vadd.f32 1e-12, %v187_v48 }
 0x220   :  { %v182_v50 = vpop.xlane.xlu1 %181  ;;  %v184_v51 = vpop.xlane.xlu0 %183 }
 0x221   :  { %282 = vrsqrt.f32 %v191_v49  ;;  %v188_v52 = vmul.f32 0.0078125, %v182_v50  ;;  %v189_v53 = vmul.f32 0.0078125, %v184_v51 }
 0x223   :  { %v192_v54 = vadd.f32 1e-12, %v188_v52  ;;  %v193_v55 = vadd.f32 1e-12, %v189_v53 }
 0x224   :  { %v186_v56 = vpop.xlane.xlu1 %185 }
 0x225   :  { %284 = vrsqrt.f32 %v192_v54  ;;  %v190_v57 = vmul.f32 0.0078125, %v186_v56 }
 0x226   :  { %286 = vrsqrt.f32 %v193_v55 }
 0x227   :  { %v194_v58 = vadd.f32 1e-12, %v190_v57 }
 0x229   :  { %288 = vrsqrt.f32 %v194_v58 }
 0x22b   :  { %v283_v59 = vpop.eup %282 }
 0x22c   :  { %v199_v61 = vmul.f32 %v283_v59, %v171_v35 }
 0x22e   :  { %v210_v63 = vmul.f32 %v242_v60, %v199_v61 }
 0x22f   :  { %v285_v0 = vpop.eup %284 }
 0x230   :  { %v287_v1 = vpop.eup %286  ;;  %v221_v2 = vadd.f32 %v243_v62, %v210_v63  ;;  %v200_v3 = vmul.f32 %v285_v0, %v172_v42 }
 0x231   :  { %v201_v4 = vmul.f32 %v287_v1, %v173_v38 }
 0x232   :  { %225 = vst [vmem:[%s400_s6] sm:$0xff] %v221_v2  ;;  %v211_v5 = vmul.f32 %v242_v60, %v200_v3 }
 0x233   :  { %v289_v6 = vpop.eup %288  ;;  %v212_v7 = vmul.f32 %v242_v60, %v201_v4 }
 0x234   :  { %v222_v8 = vadd.f32 %v243_v62, %v211_v5  ;;  %v202_v9 = vmul.f32 %v289_v6, %v174_v43 }
 0x235   :  { %v223_v10 = vadd.f32 %v243_v62, %v212_v7 }
 0x236   :  { %226 = vst [vmem:[%s400_s6 + $0x8] sm:$0xff] %v222_v8  ;;  %v213_v11 = vmul.f32 %v242_v60, %v202_v9 }
 0x237   :  { %227 = vst [vmem:[%s400_s6 + $0x10] sm:$0xff] %v223_v10 }
 0x238   :  { %v224_v12 = vadd.f32 %v243_v62, %v213_v11 }
 0x23a   :  { %228 = vst [vmem:[%s400_s6 + $0x18] sm:$0xff] %v224_v12 }

// kernel: bert_forward.16
= control target key start
LH: loop header
LB: loop body
LE: loop exit
PB: predicated region body
PF: predicated region fallthrough
CT: control target
= control target key end

     0   :  { %v618_v1 = vmov 0   ;;  %v55_v39 = vlaneseq  ;;  %s922_s1 = inlined_call_operand.vmem [shape: bf16[128,512], index: 1, kind: input, shape index: {}]   ;;  %s923_s0 = inlined_call_operand.vmem [shape: f32[32,128], index: 0, kind: input, shape index: {}]   ;;  %s924_s2 = inlined_call_operand.vmem [shape: f32[1,512], index: 2, kind: input, shape index: {}]   ;;  %s925_s3 = inlined_call_operand.vmem [shape: f32[32,512], index: 3, kind: output, shape index: {}]  }
   0x1   :  { %v538_v0 = vld [vmem:[%s922_s1 + $0x4] ss:$16 sps:$4 sm:$0xff]   ;;  %267 = vmatprep.mubr.bf16.mxu0 %v618_v1  ;;  %320 = vmatprep.mubr.bf16.mxu1 %v618_v1  ;;  %v540_v2 = vld [vmem:[%s922_s1 + $0xc] ss:$16 sps:$4 sm:$0xff]   ;;  %v542_v3 = vld [vmem:[%s922_s1] ss:$16 sps:$4 sm:$0xff]  }
   0x2   :  { %235 = vmatprep.subr.bf16.mxu0 %v538_v0  ;;  %v543_v4 = vld [vmem:[%s922_s1 + $0x8] ss:$16 sps:$4 sm:$0xff]   ;;  %288 = vmatprep.subr.bf16.mxu1 %v540_v2  ;;  %v544_v5 = vld [vmem:[%s922_s1 + $0x24] ss:$16 sps:$4 sm:$0xff]   ;;  %v546_v6 = vld [vmem:[%s922_s1 + $0x2c] ss:$16 sps:$4 sm:$0xff]  }
   0x3   :  { %236 = vmatpush1.bf16.msra.mxu0 %v542_v3  ;;  %289 = vmatpush1.bf16.msra.mxu1 %v543_v4  ;;  %v548_v7 = vld [vmem:[%s922_s1 + $0x20] ss:$16 sps:$4 sm:$0xff]   ;;  %v549_v8 = vld [vmem:[%s922_s1 + $0x28] ss:$16 sps:$4 sm:$0xff]   ;;  %v550_v9 = vld [vmem:[%s922_s1 + $0x44] ss:$16 sps:$4 sm:$0xff]  }
   0x4   :  { %237 = vmatprep.subr.bf16.mxu0 %v544_v5  ;;  %290 = vmatprep.subr.bf16.mxu1 %v546_v6  ;;  %v552_v10 = vld [vmem:[%s922_s1 + $0x4c] ss:$16 sps:$4 sm:$0xff]   ;;  %v554_v11 = vld [vmem:[%s922_s1 + $0x40] ss:$16 sps:$4 sm:$0xff]   ;;  %v555_v12 = vld [vmem:[%s922_s1 + $0x48] ss:$16 sps:$4 sm:$0xff]  }
   0x5   :  { %v556_v13 = vld [vmem:[%s922_s1 + $0x64] ss:$16 sps:$4 sm:$0xff]   ;;  %v558_v14 = vld [vmem:[%s922_s1 + $0x6c] ss:$16 sps:$4 sm:$0xff]   ;;  %v560_v15 = vld [vmem:[%s922_s1 + $0x60] ss:$16 sps:$4 sm:$0xff]  }
   0x6   :  { %v561_v16 = vld [vmem:[%s922_s1 + $0x68] ss:$16 sps:$4 sm:$0xff]   ;;  %v562_v17 = vld [vmem:[%s922_s1 + $0x84] ss:$16 sps:$4 sm:$0xff]   ;;  %v564_v18 = vld [vmem:[%s922_s1 + $0x8c] ss:$16 sps:$4 sm:$0xff]  }
   0x7   :  { %238 = vmatpush1.bf16.msra.mxu0 %v548_v7  ;;  %291 = vmatpush1.bf16.msra.mxu1 %v549_v8  ;;  %v566_v19 = vld [vmem:[%s922_s1 + $0x80] ss:$16 sps:$4 sm:$0xff]   ;;  %v567_v20 = vld [vmem:[%s922_s1 + $0x88] ss:$16 sps:$4 sm:$0xff]   ;;  %v568_v21 = vld [vmem:[%s922_s1 + $0xa4] ss:$16 sps:$4 sm:$0xff]  }
   0x8   :  { %239 = vmatprep.subr.bf16.mxu0 %v550_v9  ;;  %292 = vmatprep.subr.bf16.mxu1 %v552_v10  ;;  %v570_v22 = vld [vmem:[%s922_s1 + $0xac] ss:$16 sps:$4 sm:$0xff]   ;;  %v572_v23 = vld [vmem:[%s922_s1 + $0xa0] ss:$16 sps:$4 sm:$0xff]   ;;  %v573_v24 = vld [vmem:[%s922_s1 + $0xa8] ss:$16 sps:$4 sm:$0xff]  }
   0x9   :  { %v574_v25 = vld [vmem:[%s922_s1 + $0xc4] ss:$16 sps:$4 sm:$0xff]   ;;  %v576_v26 = vld [vmem:[%s922_s1 + $0xcc] ss:$16 sps:$4 sm:$0xff]   ;;  %v578_v27 = vld [vmem:[%s922_s1 + $0xc0] ss:$16 sps:$4 sm:$0xff]  }
   0xa   :  { %v579_v28 = vld [vmem:[%s922_s1 + $0xc8] ss:$16 sps:$4 sm:$0xff]   ;;  %v580_v29 = vld [vmem:[%s922_s1 + $0xe4] ss:$16 sps:$4 sm:$0xff]   ;;  %v582_v30 = vld [vmem:[%s922_s1 + $0xec] ss:$16 sps:$4 sm:$0xff]  }
   0xb   :  { %240 = vmatpush1.bf16.msra.mxu0 %v554_v11  ;;  %293 = vmatpush1.bf16.msra.mxu1 %v555_v12  ;;  %v584_v31 = vld [vmem:[%s922_s1 + $0xe0] ss:$16 sps:$4 sm:$0xff]   ;;  %v585_v32 = vld [vmem:[%s922_s1 + $0xe8] ss:$16 sps:$4 sm:$0xff]   ;;  %v56_v40 = vshrl.u32 %v55_v39, 7 }
   0xc   :  { %241 = vmatprep.subr.bf16.mxu0 %v556_v13  ;;  %294 = vmatprep.subr.bf16.mxu1 %v558_v14  ;;  %v15_v33 = vld [vmem:[%s923_s0] sm:$0xff]  ;;  %v16_v34 = vld [vmem:[%s923_s0 + $0x8] sm:$0xff]  ;;  %v17_v36 = vld [vmem:[%s923_s0 + $0x10] sm:$0xff] }
   0xd   :  { %v19_v35 = vpack.c.bf16 %v16_v34, %v15_v33  ;;  %v18_v37 = vld [vmem:[%s923_s0 + $0x18] sm:$0xff]  ;;  %v57_v41 = vsub.s32 0, %v56_v40  ;;  %v65_v42 = vsub.s32 2, %v56_v40  ;;  %v53_v43 = vld [vmem:[%s924_s2] sm:$0xf]  ;;  %v61_v44 = vsub.s32 1, %v56_v40 }
   0xe   :  { %v20_v38 = vpack.c.bf16 %v18_v37, %v17_v36  ;;  %v69_v45 = vsub.s32 3, %v56_v40 }
   0xf   :  { %242 = vmatpush1.bf16.msra.mxu0 %v560_v15  ;;  %295 = vmatpush1.bf16.msra.mxu1 %v561_v16  ;;  %v754_v46 = vrot.slane %v53_v43, %v57_v41  ;;  %v756_v47 = vrot.slane %v53_v43, %v65_v42  ;;  %v758_v48 = vrot.slane %v53_v43, %v61_v44 }
  0x10   :  { %243 = vmatprep.subr.bf16.mxu0 %v562_v17  ;;  %296 = vmatprep.subr.bf16.mxu1 %v564_v18  ;;  %v760_v49 = vrot.slane %v53_v43, %v69_v45 }
  0x13   :  { %244 = vmatpush1.bf16.msra.mxu0 %v566_v19  ;;  %297 = vmatpush1.bf16.msra.mxu1 %v567_v20 }
  0x14   :  { %245 = vmatprep.subr.bf16.mxu0 %v568_v21  ;;  %298 = vmatprep.subr.bf16.mxu1 %v570_v22 }
  0x17   :  { %246 = vmatpush1.bf16.msra.mxu0 %v572_v23  ;;  %299 = vmatpush1.bf16.msra.mxu1 %v573_v24 }
  0x18   :  { %247 = vmatprep.subr.bf16.mxu0 %v574_v25  ;;  %300 = vmatprep.subr.bf16.mxu1 %v576_v26 }
  0x1b   :  { %248 = vmatpush1.bf16.msra.mxu0 %v578_v27  ;;  %301 = vmatpush1.bf16.msra.mxu1 %v579_v28 }
  0x1c   :  { %249 = vmatprep.subr.bf16.mxu0 %v580_v29  ;;  %302 = vmatprep.subr.bf16.mxu1 %v582_v30 }
  0x1f   :  { %250 = vmatpush1.bf16.msra.mxu0 %v584_v31  ;;  %303 = vmatpush1.bf16.msra.mxu1 %v585_v32 }
  0x22   :  { %268 = vmatmul.mubr.bf16.vlgmr.msra.gmra.mrb[0].mxu0 %v19_v35  ;;  %321 = vmatmul.mubr.bf16.vlgmr.msra.gmra.mrb[0].mxu1 %v19_v35 }
  0x23   :  { %277 = vmatprep.mubr.bf16.mxu0 %v618_v1  ;;  %330 = vmatprep.mubr.bf16.mxu1 %v618_v1 }
  0x2a   :  { %278 = vmatmul.mubr.bf16.gmra.mrb[4].mxu0 %v20_v38  ;;  %331 = vmatmul.mubr.bf16.gmra.mrb[4].mxu1 %v20_v38 }
  0xf5   :  { %v269_v50 = vpop.f32.mrb[0].mxu0  ;;  %v322_v51 = vpop.f32.mrb[0].mxu1 }
  0xf6   :  { %v270_v52 = vadd.f32 %v269_v50, %v754_v46  ;;  %v323_v53 = vadd.f32 %v322_v51, %v756_v47  ;;  %v271_v54 = vpop.f32.mrb[1].mxu0  ;;  %v324_v55 = vpop.f32.mrb[1].mxu1 }
  0xf7   :  { %v272_v56 = vadd.f32 %v271_v54, %v758_v48  ;;  %v766_v57 = vadd.f32 %v324_v55, %v760_v49  ;;  %v273_v58 = vpop.f32.mrb[2].mxu0  ;;  %v326_v59 = vpop.f32.mrb[2].mxu1 }
  0xf8   :  { %v357_v60 = vmul.f32 0.044715, %v270_v52  ;;  %v359_v61 = vmul.f32 0.044715, %v323_v53  ;;  %v770_v2 = vadd.f32 %v273_v58, %v754_v46  ;;  %v773_v3 = vadd.f32 %v326_v59, %v756_v47  ;;  %v275_v4 = vpop.f32.mrb[3].mxu0  ;;  %v328_v5 = vpop.f32.mrb[3].mxu1 }
  0xf9   :  { %v358_v62 = vmul.f32 0.044715, %v272_v56  ;;  %v360_v63 = vmul.f32 0.044715, %v766_v57  ;;  %v777_v8 = vadd.f32 %v275_v4, %v758_v48  ;;  %v784_v20 = vadd.f32 %v328_v5, %v760_v49 }
  0xfa   :  { %v373_v0 = vmul.f32 %v357_v60, %v270_v52  ;;  %v375_v1 = vmul.f32 %v359_v61, %v323_v53  ;;  %v361_v11 = vmul.f32 0.044715, %v770_v2  ;;  %v363_v14 = vmul.f32 0.044715, %v773_v3 }
  0xfb   :  { %v374_v6 = vmul.f32 %v358_v62, %v272_v56  ;;  %v376_v7 = vmul.f32 %v360_v63, %v766_v57  ;;  %v362_v26 = vmul.f32 0.044715, %v777_v8  ;;  %v791_v29 = vmul.f32 0.5, %v270_v52 }
  0xfc   :  { %v389_v9 = vmul.f32 %v373_v0, %v270_v52  ;;  %v391_v10 = vmul.f32 %v375_v1, %v323_v53  ;;  %v377_v19 = vmul.f32 %v361_v11, %v770_v2  ;;  %v379_v25 = vmul.f32 %v363_v14, %v773_v3 }
  0xfd   :  { %v390_v12 = vmul.f32 %v374_v6, %v272_v56  ;;  %v392_v13 = vmul.f32 %v376_v7, %v766_v57  ;;  %v279_v15 = vpop.f32.mrb[4].mxu0  ;;  %v332_v16 = vpop.f32.mrb[4].mxu1  ;;  %v378_v37 = vmul.f32 %v362_v26, %v777_v8  ;;  %v364_v40 = vmul.f32 0.044715, %v784_v20 }
  0xfe   :  { %v405_v17 = vadd.f32 %v389_v9, %v270_v52  ;;  %v407_v18 = vadd.f32 %v391_v10, %v323_v53  ;;  %v281_v21 = vpop.f32.mrb[5].mxu0  ;;  %v334_v22 = vpop.f32.mrb[5].mxu1  ;;  %v393_v32 = vmul.f32 %v377_v19, %v770_v2  ;;  %v395_v36 = vmul.f32 %v379_v25, %v773_v3 }
  0xff   :  { %v406_v23 = vadd.f32 %v390_v12, %v272_v56  ;;  %v408_v24 = vadd.f32 %v392_v13, %v766_v57  ;;  %v283_v27 = vpop.f32.mrb[6].mxu0  ;;  %v789_v28 = vpop.f32.mrb[6].mxu1  ;;  %v803_v41 = vadd.f32 %v279_v15, %v754_v46  ;;  %v394_v43 = vmul.f32 %v378_v37, %v777_v8 }
 0x100   :  { %v421_v30 = vmul.f32 0.7978846, %v405_v17  ;;  %v423_v31 = vmul.f32 0.7978846, %v407_v18  ;;  %v794_v33 = vpop.f32.mrb[7].mxu0  ;;  %v798_v38 = vpop.f32.mrb[7].mxu1  ;;  %v409_v39 = vadd.f32 %v393_v32, %v770_v2  ;;  %v411_v42 = vadd.f32 %v395_v36, %v773_v3 }
 0x101   :  { %v422_v34 = vmul.f32 0.7978846, %v406_v23  ;;  %v424_v35 = vmul.f32 0.7978846, %v408_v24  ;;  %v808_v44 = vadd.f32 %v332_v16, %v756_v47  ;;  %v343_v45 = vmul.f32 0.5, %v323_v53 }
 0x102   :  { %586 = vtanh.f32 %v421_v30  ;;  %v425_v50 = vmul.f32 0.7978846, %v409_v39  ;;  %v380_v51 = vmul.f32 %v364_v40, %v784_v20  ;;  %v427_v52 = vmul.f32 0.7978846, %v411_v42 }
 0x103   :  { %588 = vtanh.f32 %v423_v31  ;;  %v410_v54 = vadd.f32 %v394_v43, %v777_v8  ;;  %v365_v55 = vmul.f32 0.044715, %v803_v41  ;;  %v342_v58 = vmul.f32 0.5, %v272_v56 }
 0x104   :  { %590 = vtanh.f32 %v422_v34  ;;  %v396_v59 = vmul.f32 %v380_v51, %v784_v20  ;;  %v367_v60 = vmul.f32 0.044715, %v808_v44  ;;  %v817_v62 = vadd.f32 %v281_v21, %v758_v48 }
 0x105   :  { %592 = vtanh.f32 %v424_v35  ;;  %v426_v61 = vmul.f32 0.7978846, %v410_v54  ;;  %v381_v53 = vmul.f32 %v365_v55, %v803_v41  ;;  %v822_v1 = vadd.f32 %v334_v22, %v760_v49 }
 0x106   :  { %594 = vtanh.f32 %v425_v50  ;;  %v412_v63 = vadd.f32 %v396_v59, %v784_v20  ;;  %v383_v0 = vmul.f32 %v367_v60, %v808_v44  ;;  %v825_v56 = vadd.f32 %v283_v27, %v754_v46 }
 0x107   :  { %596 = vtanh.f32 %v427_v52  ;;  %v344_v4 = vmul.f32 0.5, %v766_v57  ;;  %v397_v5 = vmul.f32 %v381_v53, %v803_v41  ;;  %v366_v6 = vmul.f32 0.044715, %v817_v62 }
 0x108   :  { %598 = vtanh.f32 %v426_v61  ;;  %v345_v7 = vmul.f32 0.5, %v770_v2  ;;  %v428_v9 = vmul.f32 0.7978846, %v412_v63  ;;  %v399_v10 = vmul.f32 %v383_v0, %v808_v44 }
 0x109   :  { %v368_v11 = vmul.f32 0.044715, %v822_v1  ;;  %v347_v12 = vmul.f32 0.5, %v773_v3  ;;  %v413_v13 = vadd.f32 %v397_v5, %v803_v41  ;;  %v382_v46 = vmul.f32 %v366_v6, %v817_v62 }
 0x10a   :  { %v369_v57 = vmul.f32 0.044715, %v825_v56  ;;  %v346_v15 = vmul.f32 0.5, %v777_v8  ;;  %600 = vtanh.f32 %v428_v9  ;;  %v415_v16 = vadd.f32 %v399_v10, %v808_v44 }
 0x10b   :  { %v384_v2 = vmul.f32 %v368_v11, %v822_v1  ;;  %v429_v19 = vmul.f32 0.7978846, %v413_v13  ;;  %v398_v21 = vmul.f32 %v382_v46, %v817_v62  ;;  %v845_v8 = vadd.f32 %v789_v28, %v756_v47 }
 0x10c   :  { %v587_v14 = vpop.eup %586  ;;  %v385_v3 = vmul.f32 %v369_v57, %v825_v56  ;;  %v431_v24 = vmul.f32 0.7978846, %v415_v16  ;;  %v864_v54 = vadd.f32 %v794_v33, %v758_v48  ;;  %v339_v48 = vadd.f32 %v798_v38, %v760_v49 }
 0x10d   :  { %v589_v17 = vpop.eup %588  ;;  %v453_v18 = vadd.f32 1.0, %v587_v14  ;;  %v400_v25 = vmul.f32 %v384_v2, %v822_v1  ;;  %602 = vtanh.f32 %v429_v19  ;;  %v414_v31 = vadd.f32 %v398_v21, %v817_v62 }
 0x10e   :  { %v591_v22 = vpop.eup %590  ;;  %v455_v23 = vadd.f32 1.0, %v589_v17  ;;  %604 = vtanh.f32 %v431_v24  ;;  %v370_v61 = vmul.f32 0.044715, %v864_v54  ;;  %v348_v0 = vmul.f32 0.5, %v784_v20 }
 0x10f   :  { %v593_v26 = vpop.eup %592  ;;  %v469_v27 = vmul.f32 %v453_v18, %v791_v29  ;;  %v454_v30 = vadd.f32 1.0, %v591_v22  ;;  %v416_v36 = vadd.f32 %v400_v25, %v822_v1  ;;  %v430_v39 = vmul.f32 0.7978846, %v414_v31 }
 0x110   :  { %v595_v32 = vpop.eup %594  ;;  %v471_v34 = vmul.f32 %v455_v23, %v343_v45  ;;  %v456_v35 = vadd.f32 1.0, %v593_v26  ;;  %v401_v29 = vmul.f32 %v385_v3, %v825_v56  ;;  %v371_v45 = vmul.f32 0.044715, %v845_v8 }
 0x111   :  { %v597_v37 = vpop.eup %596  ;;  %485 = vst [vmem:[%s925_s3] sm:$0xff] %v469_v27  ;;  %v470_v47 = vmul.f32 %v454_v30, %v342_v58  ;;  %v457_v28 = vadd.f32 1.0, %v595_v32  ;;  %v432_v43 = vmul.f32 0.7978846, %v416_v36  ;;  %606 = vtanh.f32 %v430_v39 }
 0x112   :  { %487 = vst [vmem:[%s925_s3 + $0x10] sm:$0xff] %v471_v34  ;;  %v472_v40 = vmul.f32 %v456_v35, %v344_v4  ;;  %v459_v42 = vadd.f32 1.0, %v597_v37  ;;  %v599_v50 = vpop.eup %598  ;;  %v417_v52 = vadd.f32 %v401_v29, %v825_v56  ;;  %v387_v59 = vmul.f32 %v371_v45, %v845_v8 }
 0x113   :  { %486 = vst [vmem:[%s925_s3 + $0x8] sm:$0xff] %v470_v47  ;;  %v473_v51 = vmul.f32 %v457_v28, %v345_v7  ;;  %v458_v58 = vadd.f32 1.0, %v599_v50  ;;  %608 = vtanh.f32 %v432_v43  ;;  %v386_v5 = vmul.f32 %v370_v61, %v864_v54 }
 0x114   :  { %488 = vst [vmem:[%s925_s3 + $0x18] sm:$0xff] %v472_v40  ;;  %v475_v55 = vmul.f32 %v459_v42, %v347_v12  ;;  %v433_v60 = vmul.f32 0.7978846, %v417_v52  ;;  %v601_v33 = vpop.eup %600  ;;  %v403_v63 = vmul.f32 %v387_v59, %v845_v8  ;;  %v372_v38 = vmul.f32 0.044715, %v339_v48 }
 0x115   :  { %489 = vst [vmem:[%s925_s3 + $0x20] sm:$0xff] %v473_v51  ;;  %v474_v53 = vmul.f32 %v458_v58, %v346_v15  ;;  %v460_v4 = vadd.f32 1.0, %v601_v33  ;;  %v402_v9 = vmul.f32 %v386_v5, %v864_v54  ;;  %v349_v11 = vmul.f32 0.5, %v803_v41 }
 0x116   :  { %491 = vst [vmem:[%s925_s3 + $0x30] sm:$0xff] %v475_v55  ;;  %610 = vtanh.f32 %v433_v60  ;;  %v419_v49 = vadd.f32 %v403_v63, %v845_v8  ;;  %v388_v13 = vmul.f32 %v372_v38, %v339_v48  ;;  %v351_v46 = vmul.f32 0.5, %v808_v44 }
 0x117   :  { %490 = vst [vmem:[%s925_s3 + $0x28] sm:$0xff] %v474_v53  ;;  %v603_v6 = vpop.eup %602  ;;  %v476_v7 = vmul.f32 %v460_v4, %v348_v0  ;;  %v418_v14 = vadd.f32 %v402_v9, %v864_v54  ;;  %v350_v41 = vmul.f32 0.5, %v817_v62  ;;  %v352_v44 = vmul.f32 0.5, %v822_v1 }
 0x118   :  { %v605_v10 = vpop.eup %604  ;;  %v461_v12 = vadd.f32 1.0, %v603_v6  ;;  %v435_v20 = vmul.f32 0.7978846, %v419_v49  ;;  %v404_v16 = vmul.f32 %v388_v13, %v339_v48  ;;  %v353_v62 = vmul.f32 0.5, %v825_v56 }
 0x119   :  { %492 = vst [vmem:[%s925_s3 + $0x38] sm:$0xff] %v476_v7  ;;  %v463_v57 = vadd.f32 1.0, %v605_v10  ;;  %v434_v18 = vmul.f32 0.7978846, %v418_v14  ;;  %v355_v31 = vmul.f32 0.5, %v845_v8  ;;  %v354_v36 = vmul.f32 0.5, %v864_v54 }
 0x11a   :  { %v477_v15 = vmul.f32 %v461_v12, %v349_v11  ;;  %612 = vtanh.f32 %v435_v20  ;;  %v420_v3 = vadd.f32 %v404_v16, %v339_v48  ;;  %v356_v28 = vmul.f32 0.5, %v339_v48 }
 0x11b   :  { %v607_v2 = vpop.eup %606  ;;  %v479_v17 = vmul.f32 %v463_v57, %v351_v46  ;;  %614 = vtanh.f32 %v434_v18 }
 0x11c   :  { %493 = vst [vmem:[%s925_s3 + $0x40] sm:$0xff] %v477_v15  ;;  %v462_v21 = vadd.f32 1.0, %v607_v2  ;;  %v436_v24 = vmul.f32 0.7978846, %v420_v3 }
 0x11d   :  { %v609_v19 = vpop.eup %608  ;;  %495 = vst [vmem:[%s925_s3 + $0x50] sm:$0xff] %v479_v17 }
 0x11e   :  { %v464_v22 = vadd.f32 1.0, %v609_v19  ;;  %v478_v23 = vmul.f32 %v462_v21, %v350_v41  ;;  %616 = vtanh.f32 %v436_v24 }
 0x120   :  { %v611_v25 = vpop.eup %610  ;;  %v480_v26 = vmul.f32 %v464_v22, %v352_v44  ;;  %494 = vst [vmem:[%s925_s3 + $0x48] sm:$0xff] %v478_v23 }
 0x121   :  { %v465_v27 = vadd.f32 1.0, %v611_v25 }
 0x122   :  { %496 = vst [vmem:[%s925_s3 + $0x58] sm:$0xff] %v480_v26 }
 0x123   :  { %v481_v30 = vmul.f32 %v465_v27, %v353_v62 }
 0x124   :  { %v613_v1 = vpop.eup %612 }
 0x125   :  { %497 = vst [vmem:[%s925_s3 + $0x60] sm:$0xff] %v481_v30  ;;  %v467_v32 = vadd.f32 1.0, %v613_v1  ;;  %v615_v34 = vpop.eup %614 }
 0x126   :  { %v466_v56 = vadd.f32 1.0, %v615_v34 }
 0x127   :  { %v483_v35 = vmul.f32 %v467_v32, %v355_v31 }
 0x128   :  { %v617_v37 = vpop.eup %616  ;;  %v482_v47 = vmul.f32 %v466_v56, %v354_v36 }
 0x129   :  { %499 = vst [vmem:[%s925_s3 + $0x70] sm:$0xff] %v483_v35  ;;  %v468_v39 = vadd.f32 1.0, %v617_v37 }
 0x12a   :  { %498 = vst [vmem:[%s925_s3 + $0x68] sm:$0xff] %v482_v47 }
 0x12b   :  { %v484_v29 = vmul.f32 %v468_v39, %v356_v28 }
 0x12d   :  { %500 = vst [vmem:[%s925_s3 + $0x78] sm:$0xff] %v484_v29 }

// kernel: bert_forward.17
= control target key start
LH: loop header
LB: loop body
LE: loop exit
PB: predicated region body
PF: predicated region fallthrough
CT: control target
= control target key end

     0   :  { %s835_s1 = inlined_call_operand.vmem [shape: bf16[512,128], index: 1, kind: input, shape index: {}]   ;;  %s836_s0 = inlined_call_operand.vmem [shape: f32[32,512], index: 0, kind: input, shape index: {}]   ;;  %s837_s2 = inlined_call_operand.vmem [shape: f32[1,128], index: 2, kind: input, shape index: {}]   ;;  %s838_s3 = inlined_call_operand.vmem [shape: f32[32,128], index: 3, kind: input, shape index: {}]   ;;  %s839_s4 = inlined_call_operand.vmem [shape: f32[1,128], index: 4, kind: input, shape index: {}]   ;;  %s840_s5 = inlined_call_operand.vmem [shape: f32[1,128], index: 5, kind: input, shape index: {}]   ;;  %s841_s6 = inlined_call_operand.vmem [shape: f32[32,128], index: 6, kind: output, shape index: {}]  }
   0x1   :  { %v583_v0 = vld [vmem:[%s835_s1 + $0x40] sm:$0xff]   ;;  %v587_v4 = vld [vmem:[%s835_s1 + $0x48] sm:$0xff]   ;;  %v591_v8 = vld [vmem:[%s835_s1 + $0x50] sm:$0xff]  }
   0x2   :  { %v584_v1 = vld [vmem:[%s835_s1 + $0xc0] sm:$0xff]   ;;  %527 = vmatprep.subr.bf16.mxu0 %v583_v0  ;;  %v588_v5 = vld [vmem:[%s835_s1 + $0xc8] sm:$0xff]   ;;  %v592_v9 = vld [vmem:[%s835_s1 + $0xd0] sm:$0xff]  }
   0x3   :  { %v585_v2 = vld [vmem:[%s835_s1] sm:$0xff]   ;;  %555 = vmatprep.subr.bf16.mxu1 %v584_v1  ;;  %v589_v6 = vld [vmem:[%s835_s1 + $0x8] sm:$0xff]   ;;  %v593_v10 = vld [vmem:[%s835_s1 + $0x10] sm:$0xff]  }
   0x4   :  { %v586_v3 = vld [vmem:[%s835_s1 + $0x80] sm:$0xff]   ;;  %528 = vmatpush3.bf16.msra.mxu0 %v585_v2  ;;  %v590_v7 = vld [vmem:[%s835_s1 + $0x88] sm:$0xff]   ;;  %v594_v11 = vld [vmem:[%s835_s1 + $0x90] sm:$0xff]  }
   0x5   :  { %556 = vmatpush3.bf16.msra.mxu1 %v586_v3  ;;  %529 = vmatprep.subr.bf16.mxu0 %v587_v4  ;;  %v595_v12 = vld [vmem:[%s835_s1 + $0x58] sm:$0xff]   ;;  %v599_v16 = vld [vmem:[%s835_s1 + $0x60] sm:$0xff]   ;;  %v603_v20 = vld [vmem:[%s835_s1 + $0x68] sm:$0xff]  }
   0x6   :  { %557 = vmatprep.subr.bf16.mxu1 %v588_v5  ;;  %v596_v13 = vld [vmem:[%s835_s1 + $0xd8] sm:$0xff]   ;;  %v600_v17 = vld [vmem:[%s835_s1 + $0xe0] sm:$0xff]   ;;  %v604_v21 = vld [vmem:[%s835_s1 + $0xe8] sm:$0xff]  }
   0x7   :  { %v597_v14 = vld [vmem:[%s835_s1 + $0x18] sm:$0xff]   ;;  %v601_v18 = vld [vmem:[%s835_s1 + $0x20] sm:$0xff]   ;;  %v605_v22 = vld [vmem:[%s835_s1 + $0x28] sm:$0xff]  }
   0x8   :  { %530 = vmatpush3.bf16.msra.mxu0 %v589_v6  ;;  %v598_v15 = vld [vmem:[%s835_s1 + $0x98] sm:$0xff]   ;;  %v602_v19 = vld [vmem:[%s835_s1 + $0xa0] sm:$0xff]   ;;  %v606_v23 = vld [vmem:[%s835_s1 + $0xa8] sm:$0xff]  }
   0x9   :  { %558 = vmatpush3.bf16.msra.mxu1 %v590_v7  ;;  %531 = vmatprep.subr.bf16.mxu0 %v591_v8  ;;  %v607_v24 = vld [vmem:[%s835_s1 + $0x70] sm:$0xff]   ;;  %v611_v28 = vld [vmem:[%s835_s1 + $0x78] sm:$0xff]   ;;  %v25_v32 = vld [vmem:[%s836_s0 + $0x8] sm:$0xff] }
   0xa   :  { %559 = vmatprep.subr.bf16.mxu1 %v592_v9  ;;  %v608_v25 = vld [vmem:[%s835_s1 + $0xf0] sm:$0xff]   ;;  %v612_v29 = vld [vmem:[%s835_s1 + $0xf8] sm:$0xff]   ;;  %v29_v33 = vld [vmem:[%s836_s0 + $0x28] sm:$0xff] }
   0xb   :  { %v609_v26 = vld [vmem:[%s835_s1 + $0x30] sm:$0xff]   ;;  %v613_v30 = vld [vmem:[%s835_s1 + $0x38] sm:$0xff]   ;;  %v41_v35 = vpack.c.bf16 %v29_v33, %v25_v32  ;;  %v24_v37 = vld [vmem:[%s836_s0] sm:$0xff] }
   0xc   :  { %532 = vmatpush3.bf16.msra.mxu0 %v593_v10  ;;  %v610_v27 = vld [vmem:[%s835_s1 + $0xb0] sm:$0xff]   ;;  %v614_v31 = vld [vmem:[%s835_s1 + $0xb8] sm:$0xff]   ;;  %v28_v38 = vld [vmem:[%s836_s0 + $0x20] sm:$0xff] }
   0xd   :  { %560 = vmatpush3.bf16.msra.mxu1 %v594_v11  ;;  %533 = vmatprep.subr.bf16.mxu0 %v595_v12  ;;  %v27_v34 = vld [vmem:[%s836_s0 + $0x18] sm:$0xff]  ;;  %v40_v40 = vpack.c.bf16 %v28_v38, %v24_v37  ;;  %v26_v41 = vld [vmem:[%s836_s0 + $0x10] sm:$0xff]  ;;  %v33_v43 = vld [vmem:[%s836_s0 + $0x48] sm:$0xff] }
   0xe   :  { %561 = vmatprep.subr.bf16.mxu1 %v596_v13  ;;  %v31_v36 = vld [vmem:[%s836_s0 + $0x38] sm:$0xff]  ;;  %v30_v42 = vld [vmem:[%s836_s0 + $0x30] sm:$0xff]  ;;  %343 = vmatprep.mubr.bf16.mxu0 %v41_v35  ;;  %v37_v45 = vld [vmem:[%s836_s0 + $0x68] sm:$0xff] }
   0xf   :  { %v43_v39 = vpack.c.bf16 %v31_v36, %v27_v34  ;;  %v42_v44 = vpack.c.bf16 %v30_v42, %v26_v41  ;;  %v35_v46 = vld [vmem:[%s836_s0 + $0x58] sm:$0xff]  ;;  %v45_v48 = vpack.c.bf16 %v37_v45, %v33_v43  ;;  %v32_v50 = vld [vmem:[%s836_s0 + $0x40] sm:$0xff]  ;;  %v34_v52 = vld [vmem:[%s836_s0 + $0x50] sm:$0xff] }
  0x10   :  { %534 = vmatpush3.bf16.msra.mxu0 %v597_v14  ;;  %v39_v47 = vld [vmem:[%s836_s0 + $0x78] sm:$0xff]  ;;  %v36_v51 = vld [vmem:[%s836_s0 + $0x60] sm:$0xff]  ;;  %v38_v53 = vld [vmem:[%s836_s0 + $0x70] sm:$0xff] }
  0x11   :  { %562 = vmatpush3.bf16.msra.mxu1 %v598_v15  ;;  %535 = vmatprep.subr.bf16.mxu0 %v599_v16  ;;  %v47_v49 = vpack.c.bf16 %v39_v47, %v35_v46  ;;  %v44_v54 = vpack.c.bf16 %v36_v51, %v32_v50  ;;  %v46_v55 = vpack.c.bf16 %v38_v53, %v34_v52  ;;  %v492_v58 = vld [vmem:[%s837_s2] ss:$0 sm:$0xff]  ;;  %v410_v14 = vld [vmem:[%s838_s3 + $0x8] sm:$0xff] }
  0x12   :  { %563 = vmatprep.subr.bf16.mxu1 %v600_v17  ;;  %392 = vmatprep.mubr.bf16.mxu1 %v43_v39  ;;  %v409_v6 = vld [vmem:[%s838_s3] sm:$0xff] }
  0x14   :  { %536 = vmatpush3.bf16.msra.mxu0 %v601_v18 }
  0x15   :  { %564 = vmatpush3.bf16.msra.mxu1 %v602_v19  ;;  %537 = vmatprep.subr.bf16.mxu0 %v603_v20 }
  0x16   :  { %565 = vmatprep.subr.bf16.mxu1 %v604_v21 }
  0x18   :  { %538 = vmatpush3.bf16.msra.mxu0 %v605_v22 }
  0x19   :  { %566 = vmatpush3.bf16.msra.mxu1 %v606_v23  ;;  %539 = vmatprep.subr.bf16.mxu0 %v607_v24 }
  0x1a   :  { %567 = vmatprep.subr.bf16.mxu1 %v608_v25 }
  0x1c   :  { %540 = vmatpush3.bf16.msra.mxu0 %v609_v26  ;;  %v411_v26 = vld [vmem:[%s838_s3 + $0x10] sm:$0xff] }
  0x1d   :  { %568 = vmatpush3.bf16.msra.mxu1 %v610_v27  ;;  %541 = vmatprep.subr.bf16.mxu0 %v611_v28 }
  0x1e   :  { %569 = vmatprep.subr.bf16.mxu1 %v612_v29 }
  0x20   :  { %542 = vmatpush3.bf16.msra.mxu0 %v613_v30 }
  0x21   :  { %570 = vmatpush3.bf16.msra.mxu1 %v614_v31  ;;  %v412_v31 = vld [vmem:[%s838_s3 + $0x18] sm:$0xff] }
  0x23   :  { %344 = vmatmul.mubr.bf16.vlgmr.msra.gmra.mrb[0].mxu0 %v40_v40 }
  0x24   :  { %393 = vmatmul.mubr.bf16.vlgmr.msra.gmra.mrb[0].mxu1 %v42_v44  ;;  %351 = vmatprep.mubr.bf16.mxu0 %v45_v48 }
  0x25   :  { %400 = vmatprep.mubr.bf16.mxu1 %v47_v49 }
  0x2b   :  { %352 = vmatmul.mubr.bf16.gmra.mrb[4].mxu0 %v44_v54 }
  0x2c   :  { %401 = vmatmul.mubr.bf16.gmra.mrb[4].mxu1 %v46_v55 }
  0xf6   :  { %v543_v56 = vpop.f32.mrb[0].mxu0 }
  0xf7   :  { %v571_v57 = vpop.f32.mrb[0].mxu1  ;;  %v544_v59 = vpop.f32.mrb[1].mxu0 }
  0xf8   :  { %v545_v60 = vadd.f32 %v544_v59, %v543_v56  ;;  %v572_v61 = vpop.f32.mrb[1].mxu1  ;;  %v546_v62 = vpop.f32.mrb[2].mxu0 }
  0xf9   :  { %v573_v63 = vadd.f32 %v572_v61, %v571_v57  ;;  %v574_v0 = vpop.f32.mrb[2].mxu1  ;;  %v547_v1 = vpop.f32.mrb[3].mxu0  ;;  %v525_v61 = vld [vmem:[%s839_s4] ss:$0 sm:$0xff] }
  0xfa   :  { %v346_v2 = vadd.f32 %v545_v60, %v492_v58  ;;  %v548_v3 = vadd.f32 %v547_v1, %v546_v62  ;;  %v575_v4 = vpop.f32.mrb[3].mxu1 }
  0xfb   :  { %v576_v5 = vadd.f32 %v575_v4, %v574_v0  ;;  %v526_v0 = vld [vmem:[%s840_s5] ss:$0 sm:$0xff] }
  0xfc   :  { %v395_v7 = vadd.f32 %v573_v63, %v346_v2  ;;  %v349_v8 = vadd.f32 %v548_v3, %v492_v58 }
  0xfe   :  { %v398_v9 = vadd.f32 %v576_v5, %v349_v8  ;;  %v549_v10 = vpop.f32.mrb[4].mxu0  ;;  %v413_v11 = vadd.f32 %v409_v6, %v395_v7 }
  0xff   :  { %v577_v12 = vpop.f32.mrb[4].mxu1  ;;  %v550_v13 = vpop.f32.mrb[5].mxu0 }
 0x100   :  { %v551_v15 = vadd.f32 %v550_v13, %v549_v10  ;;  %v578_v16 = vpop.f32.mrb[5].mxu1  ;;  %v552_v17 = vpop.f32.mrb[6].mxu0  ;;  %417 = vadd.xlane.f32.xlu0 %v413_v11  ;;  %v414_v24 = vadd.f32 %v410_v14, %v398_v9 }
 0x101   :  { %v579_v18 = vadd.f32 %v578_v16, %v577_v12  ;;  %v580_v19 = vpop.f32.mrb[6].mxu1  ;;  %v553_v20 = vpop.f32.mrb[7].mxu0 }
 0x102   :  { %v354_v21 = vadd.f32 %v551_v15, %v492_v58  ;;  %v554_v22 = vadd.f32 %v553_v20, %v552_v17  ;;  %v581_v23 = vpop.f32.mrb[7].mxu1 }
 0x103   :  { %v582_v25 = vadd.f32 %v581_v23, %v580_v19 }
 0x104   :  { %v403_v27 = vadd.f32 %v579_v18, %v354_v21  ;;  %v357_v28 = vadd.f32 %v554_v22, %v492_v58  ;;  %419 = vadd.xlane.f32.xlu0 %v414_v24 }
 0x106   :  { %v406_v29 = vadd.f32 %v582_v25, %v357_v28  ;;  %v415_v30 = vadd.f32 %v411_v26, %v403_v27 }
 0x108   :  { %421 = vadd.xlane.f32.xlu1 %v415_v30  ;;  %v416_v32 = vadd.f32 %v412_v31, %v406_v29 }
 0x10c   :  { %423 = vadd.xlane.f32.xlu1 %v416_v32 }
 0x18d   :  { %v418_v33 = vpop.xlane.xlu0 %417 }
 0x18e   :  { %v426_v34 = vmul.f32 0.0078125, %v418_v33 }
 0x190   :  { %v430_v35 = vsub.f32 %v413_v11, %v426_v34 }
 0x191   :  { %v420_v36 = vpop.xlane.xlu0 %419 }
 0x192   :  { %v427_v37 = vmul.f32 0.0078125, %v420_v36  ;;  %v434_v38 = vmul.f32 %v430_v35, %v430_v35 }
 0x194   :  { %v431_v39 = vsub.f32 %v414_v24, %v427_v37  ;;  %438 = vadd.xlane.f32.xlu0 %v434_v38 }
 0x195   :  { %v422_v40 = vpop.xlane.xlu1 %421 }
 0x196   :  { %v428_v41 = vmul.f32 0.0078125, %v422_v40  ;;  %v435_v42 = vmul.f32 %v431_v39, %v431_v39 }
 0x198   :  { %v432_v43 = vsub.f32 %v415_v30, %v428_v41  ;;  %440 = vadd.xlane.f32.xlu1 %v435_v42 }
 0x199   :  { %v424_v44 = vpop.xlane.xlu1 %423 }
 0x19a   :  { %v429_v45 = vmul.f32 0.0078125, %v424_v44  ;;  %v436_v46 = vmul.f32 %v432_v43, %v432_v43 }
 0x19c   :  { %v433_v47 = vsub.f32 %v416_v32, %v429_v45  ;;  %442 = vadd.xlane.f32.xlu0 %v436_v46 }
 0x19e   :  { %v437_v48 = vmul.f32 %v433_v47, %v433_v47 }
 0x1a0   :  { %444 = vadd.xlane.f32.xlu1 %v437_v48 }
 0x221   :  { %v439_v49 = vpop.xlane.xlu0 %438 }
 0x222   :  { %v446_v50 = vmul.f32 0.0078125, %v439_v49 }
 0x224   :  { %v450_v51 = vadd.f32 1e-12, %v446_v50 }
 0x225   :  { %v441_v52 = vpop.xlane.xlu1 %440 }
 0x226   :  { %615 = vrsqrt.f32 %v450_v51  ;;  %v447_v53 = vmul.f32 0.0078125, %v441_v52 }
 0x228   :  { %v451_v54 = vadd.f32 1e-12, %v447_v53 }
 0x229   :  { %v443_v55 = vpop.xlane.xlu0 %442 }
 0x22a   :  { %617 = vrsqrt.f32 %v451_v54  ;;  %v448_v56 = vmul.f32 0.0078125, %v443_v55 }
 0x22c   :  { %v452_v57 = vadd.f32 1e-12, %v448_v56 }
 0x22d   :  { %v445_v58 = vpop.xlane.xlu1 %444 }
 0x22e   :  { %619 = vrsqrt.f32 %v452_v57  ;;  %v449_v59 = vmul.f32 0.0078125, %v445_v58 }
 0x230   :  { %v616_v60 = vpop.eup %615  ;;  %v453_v62 = vadd.f32 1e-12, %v449_v59 }
 0x231   :  { %v458_v63 = vmul.f32 %v616_v60, %v430_v35 }
 0x232   :  { %621 = vrsqrt.f32 %v453_v62 }
 0x233   :  { %v469_v1 = vmul.f32 %v525_v61, %v458_v63 }
 0x234   :  { %v618_v2 = vpop.eup %617 }
 0x235   :  { %v480_v3 = vadd.f32 %v526_v0, %v469_v1  ;;  %v459_v4 = vmul.f32 %v618_v2, %v431_v39 }
 0x237   :  { %484 = vst [vmem:[%s841_s6] sm:$0xff] %v480_v3  ;;  %v470_v5 = vmul.f32 %v525_v61, %v459_v4 }
 0x238   :  { %v620_v6 = vpop.eup %619 }
 0x239   :  { %v481_v7 = vadd.f32 %v526_v0, %v470_v5  ;;  %v460_v8 = vmul.f32 %v620_v6, %v432_v43 }
 0x23b   :  { %485 = vst [vmem:[%s841_s6 + $0x8] sm:$0xff] %v481_v7  ;;  %v471_v9 = vmul.f32 %v525_v61, %v460_v8 }
 0x23c   :  { %v622_v10 = vpop.eup %621 }
 0x23d   :  { %v482_v11 = vadd.f32 %v526_v0, %v471_v9  ;;  %v461_v12 = vmul.f32 %v622_v10, %v433_v47 }
 0x23f   :  { %486 = vst [vmem:[%s841_s6 + $0x10] sm:$0xff] %v482_v11  ;;  %v472_v13 = vmul.f32 %v525_v61, %v461_v12 }
 0x241   :  { %v483_v14 = vadd.f32 %v526_v0, %v472_v13 }
 0x243   :  { %487 = vst [vmem:[%s841_s6 + $0x18] sm:$0xff] %v483_v14 }

// kernel: bert_forward.23
= control target key start
LH: loop header
LB: loop body
LE: loop exit
PB: predicated region body
PF: predicated region fallthrough
CT: control target
= control target key end

     0   :  { %v351_v0 = vmov 0.0   ;;  %vm352_vm0 = vmmov 0   ;;  %vm249_vm1 = vcmask 1024   ;;  %s443_s1 = inlined_call_operand.vmem [shape: bf16[128,128], index: 1, kind: input, shape index: {}]   ;;  %s444_s3 = inlined_call_operand.vmem [shape: bf16[128,1], index: 3, kind: input, shape index: {}]   ;;  %s445_s0 = inlined_call_operand.vmem [shape: f32[2,128], index: 0, kind: input, shape index: {}]   ;;  %s446_s4 = inlined_call_operand.<no memory space> [shape: f32[1,1], index: 4, kind: input, shape index: {}]   ;;  %s447_s2 = inlined_call_operand.vmem [shape: f32[1,128], index: 2, kind: input, shape index: {}]   ;;  %s448_s5 = inlined_call_operand.vmem [shape: f32[2,1], index: 5, kind: output, shape index: {}]  }
   0x1   :  { %291 = vmatprep.subr.bf16.mxu0 %v351_v0  ;;  %v333_v1 = vld [vmem:[%s443_s1] sm:$0xff]   ;;  %307 = vmatprep.mubr.msk.bf16.mxu0 %vm352_vm0, %v351_v0  ;;  %v334_v2 = vld [vmem:[%s443_s1 + $0x8] sm:$0xff]   ;;  %v335_v3 = vld [vmem:[%s443_s1 + $0x10] sm:$0xff]   ;;  %v10_v19 = vstv %s446_s4 }
   0x2   :  { %311 = vmatprep.subr.bf16.mxu1 %v351_v0  ;;  %327 = vmatprep.mubr.msk.bf16.mxu1 %vm352_vm0, %v351_v0  ;;  %v341_v4 = vld [vmem:[%s444_s3] sm:$0xff]   ;;  %v336_v5 = vld [vmem:[%s443_s1 + $0x18] sm:$0xff]   ;;  %v342_v6 = vld [vmem:[%s444_s3 + $0x8] sm:$0xff]   ;;  %11 = vst [vmem:[#allocation2] sm:$0x1] %v10_v19 }
   0x3   :  { %292 = vmatpush3.bf16.msra.mxu0 %v333_v1  ;;  %312 = vmatpush3.bf16.msra.mxu1 %v341_v4  ;;  %v337_v7 = vld [vmem:[%s443_s1 + $0x20] sm:$0xff]   ;;  %v343_v8 = vld [vmem:[%s444_s3 + $0x10] sm:$0xff]   ;;  %v338_v9 = vld [vmem:[%s443_s1 + $0x28] sm:$0xff]  }
   0x4   :  { %293 = vmatprep.subr.bf16.mxu0 %v351_v0  ;;  %313 = vmatprep.subr.bf16.mxu1 %v351_v0  ;;  %v344_v10 = vld [vmem:[%s444_s3 + $0x18] sm:$0xff]   ;;  %v339_v11 = vld [vmem:[%s443_s1 + $0x30] sm:$0xff]   ;;  %v23_v13 = vld [vmem:[%s445_s0] sm:$0x3] }
   0x5   :  { %v340_v12 = vld [vmem:[%s443_s1 + $0x38] sm:$0xff]   ;;  %v24_v14 = vpack.c.bf16 %v23_v13, %v23_v13  ;;  %v345_v15 = vld [vmem:[%s444_s3 + $0x20] sm:$0xff]   ;;  %v346_v16 = vld [vmem:[%s444_s3 + $0x28] sm:$0xff]  }
   0x6   :  { %v347_v17 = vld [vmem:[%s444_s3 + $0x30] sm:$0xff]   ;;  %v348_v18 = vld [vmem:[%s444_s3 + $0x38] sm:$0xff]   ;;  %v255_v20 = vld [vmem:[%s447_s2] ss:$0 sm:$0xff] }
   0x7   :  { %294 = vmatpush3.bf16.msra.mxu0 %v334_v2  ;;  %314 = vmatpush3.bf16.msra.mxu1 %v342_v6 }
   0x8   :  { %295 = vmatprep.subr.bf16.mxu0 %v351_v0  ;;  %315 = vmatprep.subr.bf16.mxu1 %v351_v0 }
   0x9   :  { %v264_v28 = vld [vmem:[#allocation2] ss:$0 sm:$0xff] }
   0xb   :  { %296 = vmatpush3.bf16.msra.mxu0 %v335_v3  ;;  %316 = vmatpush3.bf16.msra.mxu1 %v343_v8 }
   0xc   :  { %297 = vmatprep.subr.bf16.mxu0 %v351_v0  ;;  %317 = vmatprep.subr.bf16.mxu1 %v351_v0 }
   0xf   :  { %298 = vmatpush3.bf16.msra.mxu0 %v336_v5  ;;  %318 = vmatpush3.bf16.msra.mxu1 %v344_v10 }
  0x10   :  { %299 = vmatprep.subr.bf16.mxu0 %v351_v0  ;;  %319 = vmatprep.subr.bf16.mxu1 %v351_v0 }
  0x13   :  { %300 = vmatpush3.bf16.msra.mxu0 %v337_v7  ;;  %320 = vmatpush3.bf16.msra.mxu1 %v345_v15 }
  0x14   :  { %301 = vmatprep.subr.bf16.mxu0 %v351_v0  ;;  %321 = vmatprep.subr.bf16.mxu1 %v351_v0 }
  0x17   :  { %302 = vmatpush3.bf16.msra.mxu0 %v338_v9  ;;  %322 = vmatpush3.bf16.msra.mxu1 %v346_v16 }
  0x18   :  { %303 = vmatprep.subr.bf16.mxu0 %v351_v0  ;;  %323 = vmatprep.subr.bf16.mxu1 %v351_v0 }
  0x1b   :  { %304 = vmatpush3.bf16.msra.mxu0 %v339_v11  ;;  %324 = vmatpush3.bf16.msra.mxu1 %v347_v17 }
  0x1c   :  { %305 = vmatprep.subr.bf16.mxu0 %v351_v0  ;;  %325 = vmatprep.subr.bf16.mxu1 %v351_v0 }
  0x1f   :  { %306 = vmatpush3.bf16.msra.mxu0 %v340_v12  ;;  %326 = vmatpush3.bf16.msra.mxu1 %v348_v18 }
  0x22   :  { %308 = vmatmul.mubr.bf16.vlgmr.msra.gmra.mrb[0].mxu0 %v24_v14 }
  0xf5   :  { %v130_v21 = vpop.f32.mrb[0].mxu0 }
  0xf6   :  { %v131_v22 = vadd.f32 %v255_v20, %v130_v21  ;;  %v309_v23 = vpop.f32.mrb[1].mxu0 }
  0xf7   :  { %v133_v24 = vpop.f32.mrb[2].mxu0 }
  0xf8   :  { %349 = vtanh.f32 %v131_v22  ;;  %v310_v25 = vpop.f32.mrb[3].mxu0 }
 0x102   :  { %v350_v26 = vpop.eup %349 }
 0x103   :  { %v137_v27 = vpack.c.bf16 %v350_v26, %v350_v26 }
 0x105   :  { %328 = vmatmul.mubr.bf16.vlgmr.msra.gmra.mrb[0].mxu1 %v137_v27 }
 0x1d8   :  { %v243_v29 = vpop.f32.mrb[0].mxu1 }
 0x1d9   :  { %v244_v30 = vadd.f32 %v264_v28, %v243_v29  ;;  %v329_v31 = vpop.f32.mrb[1].mxu1 }
 0x1da   :  { %v246_v32 = vpop.f32.mrb[2].mxu1 }
 0x1db   :  { %250 = vst.msk [vmem:[%s448_s5] sm:$0x3] %vm249_vm1, %v244_v30  ;;  %v330_v33 = vpop.f32.mrb[3].mxu1 }

</bundles_post_ra>
